<compile_context>
chip_gen: v7x
topology: tpu7x:2x2x1
jax: 0.10.0
libtpu: 0.0.40
codegen_flags: <defaults>
</compile_context>

<pallas_src>
import numpy as np
import jax
import jax.numpy as jnp
from jax.experimental import pallas as pl
from jax.experimental.pallas import tpu as pltpu

NUM_BANDS = 4          # mbfx.num_bands (== fake_num_bands)
PARAMS_PER_BAND = 2    # mbfx.total_num_params_per_band -> (gain, drive)
TAPS = 9               # FIR length of the synthetic band-split filterbank
HALO = TAPS - 1        # causal history needed per output sample
SUB = 8                # f32 vreg sublanes: pack time pieces into sublanes
RATE = 16000           # sample rate (the stand-in FX uses normalized freqs)
GD_LEN = NUM_BANDS * TAPS + NUM_BANDS   # 36 drive-folded coeffs + 4 gains


def _make_filterbank(num_bands=NUM_BANDS, taps=TAPS):
    """Deterministic windowed-cosine bandpass filterbank (crossover stand-in)."""
    k = np.arange(taps, dtype=np.float64)
    hann = 0.5 - 0.5 * np.cos(2.0 * np.pi * (k + 1) / (taps + 1))
    filt = np.zeros((num_bands, taps), dtype=np.float64)
    for b in range(num_bands):
        w = np.pi * (b + 0.5) / num_bands
        h = np.cos(w * (k - (taps - 1) / 2.0)) * hann
        h = h / np.sum(np.abs(h))
        filt[b] = h
    return filt.astype(np.float32)


_FILT_NP = _make_filterbank()


def _set_fx_params(settings, param_range):
    """mbfx.set_fx_params(params, flat=True, param_range=...) equivalent:
    map normalized settings in [0,1] to per-band (gain, drive) values."""
    s = settings.reshape(NUM_BANDS, PARAMS_PER_BAND).astype(jnp.float32)
    lo = param_range[:, 0][None, :]
    hi = param_range[:, 1][None, :]
    actual = lo + s * (hi - lo)
    return actual[:, 0], actual[:, 1]          # gains, drives  (NUM_BANDS,)


def _mbfx_kernel(gd_ref, x_ref, out_ref, carry_ref):
    # gd_ref   : SMEM (GD_LEN,)  -- 36 drive-folded FIR coeffs, then 4 gains.
    # x_ref    : VMEM (CHUNKS, SUB, CHUNK) -- CHUNKS*SUB consecutive CHUNK-long
    #            pieces of ONE batch row, so all 8 sublanes of every f32 vreg
    #            carry audio regardless of batch size.
    # out_ref  : VMEM, same shape as x_ref.
    # carry_ref: VMEM (1, HALO)  -- tail of the previously processed piece
    #            (causal FIR history across pieces and time tiles).
    t = pl.program_id(1)

    @pl.when(t == 0)                           # new batch row: zero FIR history
    def _():
        carry_ref[...] = jnp.zeros_like(carry_ref)

    # Hoist every scalar read (and implied broadcast) out of the piece loop.
    coeff = [[gd_ref[b * TAPS + k] for k in range(TAPS)]
             for b in range(NUM_BANDS)]
    gain = [gd_ref[NUM_BANDS * TAPS + b] for b in range(NUM_BANDS)]

    n_chunks, _, chunk = x_ref.shape

    # Rolled loop over 512-lane pieces bounds the vreg live set (~30 vregs);
    # a fully unrolled / whole-tile formulation spills the 64-entry vreg file.
    @pl.loop(0, n_chunks)
    def _(c):
        x = x_ref[c]                                    # (SUB, CHUNK)
        tails = x[:, chunk - HALO:]                     # (SUB, HALO)
        # Causal halo per sub-row: row r>0 takes row r-1's tail inside this
        # piece; row 0 takes the carry (tail of the previous piece / tile).
        halo = jnp.concatenate([carry_ref[...], tails[:SUB - 1, :]], axis=0)
        xcat = jnp.concatenate([halo, x], axis=-1)      # (SUB, CHUNK + HALO)

        # FIR filterbank: tap-outer / band-inner so each shifted view (5 vregs)
        # is built once per piece and reused by all bands.  Drive is folded
        # into the coefficients; accumulators start from the first term.
        bands = [None] * NUM_BANDS
        for k in range(TAPS):
            xs = x if k == HALO else xcat[:, k:k + chunk]
            for b in range(NUM_BANDS):
                term = coeff[b][k] * xs
                bands[b] = term if bands[b] is None else bands[b] + term

        # Per-band tanh drive (EUP) + gain, summed into this output piece.
        acc = gain[0] * jnp.tanh(bands[0])
        for b in range(1, NUM_BANDS):
            acc = acc + gain[b] * jnp.tanh(bands[b])
        out_ref[c] = acc.astype(out_ref.dtype)          # lane-dense aligned store

        # History for the next piece (and, after the last piece, the next tile).
        carry_ref[...] = tails[SUB - 1:, :]


def mbfx_layer_forward(x, settings, param_range, rate=RATE, *,
                       chunk=512, chunks_per_block=16):
    """MBFxLayer.forward / MBFxFunction.forward semantics (same settings for
    every batch element); returns the processed batch, float32, shape of x
    (with a leading batch dim added for 1-D input, like the PyTorch module)."""
    del rate  # the synthetic stand-in FX uses normalized freqs (rate-free)
    if x.ndim == 1:
        x = x[None, :]
    x = x.astype(jnp.float32)
    B, N = x.shape

    # Lane-dense, (8,128)-aligned tiling; the halo logic needs chunk >= HALO.
    assert chunk % 128 == 0 and chunk >= HALO and chunks_per_block >= 1

    gains, drives = _set_fx_params(settings, param_range)
    filt = jnp.asarray(_FILT_NP)                              # (BANDS, TAPS)
    coeff = (drives[:, None] * filt).reshape(-1)              # fold drive into FIR
    gd = jnp.concatenate([coeff, gains]).astype(jnp.float32)  # (GD_LEN,)

    block = chunks_per_block * SUB * chunk    # samples per grid step (64K default)
    n_pad = (-N) % block
    if n_pad:  # trailing zeros only; the causal FIR leaves the first N outputs exact
        x = jnp.pad(x, ((0, 0), (0, n_pad)))
    Np = N + n_pad
    T = Np // block
    x5 = x.reshape(B, T, chunks_per_block, SUB, chunk)   # contiguous -> free reshape

    flops_per_sample = 2 * NUM_BANDS * TAPS + 2 * NUM_BANDS
    cost = pl.CostEstimate(
        flops=flops_per_sample * B * Np,
        transcendentals=NUM_BANDS * B * Np,
        bytes_accessed=2 * B * Np * 4 + GD_LEN * 4,
    )

    out5 = pl.pallas_call(
        _mbfx_kernel,
        out_shape=jax.ShapeDtypeStruct((B, T, chunks_per_block, SUB, chunk),
                                       jnp.float32),
        grid=(B, T),
        in_specs=[
            pl.BlockSpec((GD_LEN,), lambda b, t: (0,),
                         memory_space=pltpu.MemorySpace.SMEM),
            pl.BlockSpec((None, None, chunks_per_block, SUB, chunk),
                         lambda b, t: (b, t, 0, 0, 0)),
        ],
        out_specs=pl.BlockSpec((None, None, chunks_per_block, SUB, chunk),
                               lambda b, t: (b, t, 0, 0, 0)),
        scratch_shapes=[pltpu.VMEM((1, HALO), jnp.float32)],
        # NOTE: the carry recurrence requires the time axis to stay innermost
        # and "arbitrary"; the batch axis is independent -> "parallel".
        compiler_params=pltpu.CompilerParams(
            dimension_semantics=("parallel", "arbitrary")),
        cost_estimate=cost,
    )(gd, x5)

    out = out5.reshape(B, Np)
    if n_pad:
        out = out[:, :N]
    return out


def mbfx_reference(x, settings, param_range):
    """Pure-JAX reference of the same synthetic multiband FX."""
    if x.ndim == 1:
        x = x[None, :]
    x = x.astype(jnp.float32)
    N = x.shape[1]
    gains, drives = _set_fx_params(settings, param_range)
    filt = jnp.asarray(_FILT_NP)
    xpad = jnp.pad(x, ((0, 0), (TAPS - 1, 0)))      # causal zero padding
    out = jnp.zeros_like(x)
    for b in range(NUM_BANDS):
        band = jnp.zeros_like(x)
        for k in range(TAPS):
            band = band + filt[b, k] * xpad[:, k:k + N]
        out = out + gains[b] * jnp.tanh(drives[b] * band)
    return out


if __name__ == "__main__":
    key = jax.random.PRNGKey(0)
    kx, ks = jax.random.split(key)

    B, N = 2, 65536            # 2 sounds, ~4 s at 16 kHz
    x = jax.random.normal(kx, (B, N), dtype=jnp.float32)
    # MBFxLayer.__init__: params = ones(num_params) * 0.5 (normalized settings);
    # forward takes `settings` explicitly, so draw a deterministic [0,1] vector.
    num_params = NUM_BANDS * PARAMS_PER_BAND
    settings = jax.random.uniform(ks, (num_params,), dtype=jnp.float32)
    # param_range: per-param-type (min, max) -> gain in [0,2], drive in [0.5,4]
    param_range = jnp.array([[0.0, 2.0], [0.5, 4.0]], dtype=jnp.float32)

    ref = mbfx_reference(x, settings, param_range)

    # Default config: one 64K-sample block per batch row (grid = (2, 1)).
    out = jax.block_until_ready(mbfx_layer_forward(x, settings, param_range))
    np.testing.assert_allclose(np.asarray(out), np.asarray(ref),
                               rtol=1e-5, atol=5e-5)
    assert out.shape == (B, N) and out.dtype == jnp.float32

    # Smaller blocks: exercises the cross-tile carry path (grid = (2, 4)).
    out_small = jax.block_until_ready(
        mbfx_layer_forward(x, settings, param_range, chunks_per_block=4))
    np.testing.assert_allclose(np.asarray(out_small), np.asarray(ref),
                               rtol=1e-5, atol=5e-5)

    # 1-D input whose length is not a multiple of the block (padding path).
    x1 = jax.random.normal(jax.random.PRNGKey(1), (10000,), dtype=jnp.float32)
    out1 = jax.block_until_ready(mbfx_layer_forward(x1, settings, param_range))
    ref1 = mbfx_reference(x1, settings, param_range)
    np.testing.assert_allclose(np.asarray(out1), np.asarray(ref1),
                               rtol=1e-5, atol=5e-5)

    print("KERNEL_OK")
</pallas_src>

<mosaic_0001>
module attributes {stable_mosaic.version = 11 : i64} {
  func.func @_mbfx_kernel(%arg0: i32, %arg1: i32, %arg2: memref<40xf32, #tpu.memory_space<smem>>, %arg3: memref<1x1x16x8x512xf32, #tpu.memory_space<vmem>>, %arg4: memref<1x1x16x8x512xf32, #tpu.memory_space<vmem>>, %arg5: memref<1x8xf32, #tpu.memory_space<vmem>>) attributes {dimension_semantics = [#tpu.dimension_semantics<parallel>, #tpu.dimension_semantics<arbitrary>], iteration_bounds = array<i64: 2, 1>, scalar_prefetch = 0 : i64, scratch_operands = 1 : i64, tpu.core_type = #tpu.core_type<tc>, window_params = [{transform_indices = @transform_0, window_bounds = array<i64: 40>}, {transform_indices = @transform_1, window_bounds = array<i64: 1, 1, 16, 8, 512>}, {transform_indices = @transform_2, window_bounds = array<i64: 1, 1, 16, 8, 512>}]} {
    %c0_i32 = arith.constant 0 : i32
    %0 = arith.cmpi eq, %arg1, %c0_i32 : i32
    %1 = arith.extui %0 : i1 to i32
    %c0_i32_0 = arith.constant 0 : i32
    %2 = arith.cmpi ne, %1, %c0_i32_0 : i32
    scf.if %2 {
      %cst = arith.constant 0.000000e+00 : f32
      %44 = vector.broadcast %cst : f32 to vector<1x8xf32>
      %c0_3 = arith.constant 0 : index
      %c0_4 = arith.constant 0 : index
      %45 = vector.load %arg5[%c0_3, %c0_4] : memref<1x8xf32, #tpu.memory_space<vmem>>, vector<1x8xf32>
      tpu.vector_store %arg5[%c0_3, %c0_4], %44 {strides = array<i32>} : memref<1x8xf32, #tpu.memory_space<vmem>>, vector<1x8xf32>,
    } else {
    }
    %c0 = arith.constant 0 : index
    %3 = memref.load %arg2[%c0] : memref<40xf32, #tpu.memory_space<smem>>
    %c1 = arith.constant 1 : index
    %4 = memref.load %arg2[%c1] : memref<40xf32, #tpu.memory_space<smem>>
    %c2 = arith.constant 2 : index
    %5 = memref.load %arg2[%c2] : memref<40xf32, #tpu.memory_space<smem>>
    %c3 = arith.constant 3 : index
    %6 = memref.load %arg2[%c3] : memref<40xf32, #tpu.memory_space<smem>>
    %c4 = arith.constant 4 : index
    %7 = memref.load %arg2[%c4] : memref<40xf32, #tpu.memory_space<smem>>
    %c5 = arith.constant 5 : index
    %8 = memref.load %arg2[%c5] : memref<40xf32, #tpu.memory_space<smem>>
    %c6 = arith.constant 6 : index
    %9 = memref.load %arg2[%c6] : memref<40xf32, #tpu.memory_space<smem>>
    %c7 = arith.constant 7 : index
    %10 = memref.load %arg2[%c7] : memref<40xf32, #tpu.memory_space<smem>>
    %c8 = arith.constant 8 : index
    %11 = memref.load %arg2[%c8] : memref<40xf32, #tpu.memory_space<smem>>
    %c9 = arith.constant 9 : index
    %12 = memref.load %arg2[%c9] : memref<40xf32, #tpu.memory_space<smem>>
    %c10 = arith.constant 10 : index
    %13 = memref.load %arg2[%c10] : memref<40xf32, #tpu.memory_space<smem>>
    %c11 = arith.constant 11 : index
    %14 = memref.load %arg2[%c11] : memref<40xf32, #tpu.memory_space<smem>>
    %c12 = arith.constant 12 : index
    %15 = memref.load %arg2[%c12] : memref<40xf32, #tpu.memory_space<smem>>
    %c13 = arith.constant 13 : index
    %16 = memref.load %arg2[%c13] : memref<40xf32, #tpu.memory_space<smem>>
    %c14 = arith.constant 14 : index
    %17 = memref.load %arg2[%c14] : memref<40xf32, #tpu.memory_space<smem>>
    %c15 = arith.constant 15 : index
    %18 = memref.load %arg2[%c15] : memref<40xf32, #tpu.memory_space<smem>>
    %c16 = arith.constant 16 : index
    %19 = memref.load %arg2[%c16] : memref<40xf32, #tpu.memory_space<smem>>
    %c17 = arith.constant 17 : index
    %20 = memref.load %arg2[%c17] : memref<40xf32, #tpu.memory_space<smem>>
    %c18 = arith.constant 18 : index
    %21 = memref.load %arg2[%c18] : memref<40xf32, #tpu.memory_space<smem>>
    %c19 = arith.constant 19 : index
    %22 = memref.load %arg2[%c19] : memref<40xf32, #tpu.memory_space<smem>>
    %c20 = arith.constant 20 : index
    %23 = memref.load %arg2[%c20] : memref<40xf32, #tpu.memory_space<smem>>
    %c21 = arith.constant 21 : index
    %24 = memref.load %arg2[%c21] : memref<40xf32, #tpu.memory_space<smem>>
    %c22 = arith.constant 22 : index
    %25 = memref.load %arg2[%c22] : memref<40xf32, #tpu.memory_space<smem>>
    %c23 = arith.constant 23 : index
    %26 = memref.load %arg2[%c23] : memref<40xf32, #tpu.memory_space<smem>>
    %c24 = arith.constant 24 : index
    %27 = memref.load %arg2[%c24] : memref<40xf32, #tpu.memory_space<smem>>
    %c25 = arith.constant 25 : index
    %28 = memref.load %arg2[%c25] : memref<40xf32, #tpu.memory_space<smem>>
    %c26 = arith.constant 26 : index
    %29 = memref.load %arg2[%c26] : memref<40xf32, #tpu.memory_space<smem>>
    %c27 = arith.constant 27 : index
    %30 = memref.load %arg2[%c27] : memref<40xf32, #tpu.memory_space<smem>>
    %c28 = arith.constant 28 : index
    %31 = memref.load %arg2[%c28] : memref<40xf32, #tpu.memory_space<smem>>
    %c29 = arith.constant 29 : index
    %32 = memref.load %arg2[%c29] : memref<40xf32, #tpu.memory_space<smem>>
    %c30 = arith.constant 30 : index
    %33 = memref.load %arg2[%c30] : memref<40xf32, #tpu.memory_space<smem>>
    %c31 = arith.constant 31 : index
    %34 = memref.load %arg2[%c31] : memref<40xf32, #tpu.memory_space<smem>>
    %c32 = arith.constant 32 : index
    %35 = memref.load %arg2[%c32] : memref<40xf32, #tpu.memory_space<smem>>
    %c33 = arith.constant 33 : index
    %36 = memref.load %arg2[%c33] : memref<40xf32, #tpu.memory_space<smem>>
    %c34 = arith.constant 34 : index
    %37 = memref.load %arg2[%c34] : memref<40xf32, #tpu.memory_space<smem>>
    %c35 = arith.constant 35 : index
    %38 = memref.load %arg2[%c35] : memref<40xf32, #tpu.memory_space<smem>>
    %c36 = arith.constant 36 : index
    %39 = memref.load %arg2[%c36] : memref<40xf32, #tpu.memory_space<smem>>
    %c37 = arith.constant 37 : index
    %40 = memref.load %arg2[%c37] : memref<40xf32, #tpu.memory_space<smem>>
    %c38 = arith.constant 38 : index
    %41 = memref.load %arg2[%c38] : memref<40xf32, #tpu.memory_space<smem>>
    %c39 = arith.constant 39 : index
    %42 = memref.load %arg2[%c39] : memref<40xf32, #tpu.memory_space<smem>>
    %c0_i32_1 = arith.constant 0 : i32
    %c16_i32 = arith.constant 16 : i32
    %43 = arith.addi %c0_i32_1, %c16_i32 : i32
    %c1_i32 = arith.constant 1 : i32
    scf.for %arg6 = %c0_i32_1 to %43 step %c1_i32  : i32 {
      %c1_i32_3 = arith.constant 1 : i32
      %44 = arith.muli %arg6, %c1_i32_3 : i32
      %c0_i32_4 = arith.constant 0 : i32
      %45 = arith.addi %c0_i32_4, %44 : i32
      %c0_5 = arith.constant 0 : index
      %c0_6 = arith.constant 0 : index
      %46 = arith.index_cast %45 : i32 to index
      %c0_7 = arith.constant 0 : index
      %c0_8 = arith.constant 0 : index
      %47 = vector.load %arg3[%c0_5, %c0_6, %46, %c0_7, %c0_8] : memref<1x1x16x8x512xf32, #tpu.memory_space<vmem>>, vector<1x1x1x8x512xf32>
      %48 = vector.shape_cast %47 : vector<1x1x1x8x512xf32> to vector<8x512xf32>
      %49 = vector.extract_strided_slice %48 {offsets = [0, 504], sizes = [8, 8], strides = [1, 1]} : vector<8x512xf32> to vector<8x8xf32>
      %c0_9 = arith.constant 0 : index
      %c0_10 = arith.constant 0 : index
      %50 = vector.load %arg5[%c0_9, %c0_10] : memref<1x8xf32, #tpu.memory_space<vmem>>, vector<1x8xf32>
      %51 = vector.extract_strided_slice %49 {offsets = [0, 0], sizes = [7, 8], strides = [1, 1]} : vector<8x8xf32> to vector<7x8xf32>
      %52 = tpu.concatenate %50, %51 in 0 : vector<1x8xf32>, vector<7x8xf32> -> vector<8x8xf32>
      %53 = tpu.concatenate %52, %48 in 1 : vector<8x8xf32>, vector<8x512xf32> -> vector<8x520xf32>
      %54 = vector.extract_strided_slice %53 {offsets = [0, 0], sizes = [8, 512], strides = [1, 1]} : vector<8x520xf32> to vector<8x512xf32>
      %55 = vector.broadcast %3 : f32 to vector<8x512xf32>
      %56 = arith.mulf %55, %54 : vector<8x512xf32>
      %57 = vector.broadcast %12 : f32 to vector<8x512xf32>
      %58 = arith.mulf %57, %54 : vector<8x512xf32>
      %59 = vector.broadcast %21 : f32 to vector<8x512xf32>
      %60 = arith.mulf %59, %54 : vector<8x512xf32>
      %61 = vector.broadcast %30 : f32 to vector<8x512xf32>
      %62 = arith.mulf %61, %54 : vector<8x512xf32>
      %63 = vector.extract_strided_slice %53 {offsets = [0, 1], sizes = [8, 512], strides = [1, 1]} : vector<8x520xf32> to vector<8x512xf32>
      %64 = vector.broadcast %4 : f32 to vector<8x512xf32>
      %65 = arith.mulf %64, %63 : vector<8x512xf32>
      %66 = arith.addf %56, %65 : vector<8x512xf32>
      %67 = vector.broadcast %13 : f32 to vector<8x512xf32>
      %68 = arith.mulf %67, %63 : vector<8x512xf32>
      %69 = arith.addf %58, %68 : vector<8x512xf32>
      %70 = vector.broadcast %22 : f32 to vector<8x512xf32>
      %71 = arith.mulf %70, %63 : vector<8x512xf32>
      %72 = arith.addf %60, %71 : vector<8x512xf32>
      %73 = vector.broadcast %31 : f32 to vector<8x512xf32>
      %74 = arith.mulf %73, %63 : vector<8x512xf32>
      %75 = arith.addf %62, %74 : vector<8x512xf32>
      %76 = vector.extract_strided_slice %53 {offsets = [0, 2], sizes = [8, 512], strides = [1, 1]} : vector<8x520xf32> to vector<8x512xf32>
      %77 = vector.broadcast %5 : f32 to vector<8x512xf32>
      %78 = arith.mulf %77, %76 : vector<8x512xf32>
      %79 = arith.addf %66, %78 : vector<8x512xf32>
      %80 = vector.broadcast %14 : f32 to vector<8x512xf32>
      %81 = arith.mulf %80, %76 : vector<8x512xf32>
      %82 = arith.addf %69, %81 : vector<8x512xf32>
      %83 = vector.broadcast %23 : f32 to vector<8x512xf32>
      %84 = arith.mulf %83, %76 : vector<8x512xf32>
      %85 = arith.addf %72, %84 : vector<8x512xf32>
      %86 = vector.broadcast %32 : f32 to vector<8x512xf32>
      %87 = arith.mulf %86, %76 : vector<8x512xf32>
      %88 = arith.addf %75, %87 : vector<8x512xf32>
      %89 = vector.extract_strided_slice %53 {offsets = [0, 3], sizes = [8, 512], strides = [1, 1]} : vector<8x520xf32> to vector<8x512xf32>
      %90 = vector.broadcast %6 : f32 to vector<8x512xf32>
      %91 = arith.mulf %90, %89 : vector<8x512xf32>
      %92 = arith.addf %79, %91 : vector<8x512xf32>
      %93 = vector.broadcast %15 : f32 to vector<8x512xf32>
      %94 = arith.mulf %93, %89 : vector<8x512xf32>
      %95 = arith.addf %82, %94 : vector<8x512xf32>
      %96 = vector.broadcast %24 : f32 to vector<8x512xf32>
      %97 = arith.mulf %96, %89 : vector<8x512xf32>
      %98 = arith.addf %85, %97 : vector<8x512xf32>
      %99 = vector.broadcast %33 : f32 to vector<8x512xf32>
      %100 = arith.mulf %99, %89 : vector<8x512xf32>
      %101 = arith.addf %88, %100 : vector<8x512xf32>
      %102 = vector.extract_strided_slice %53 {offsets = [0, 4], sizes = [8, 512], strides = [1, 1]} : vector<8x520xf32> to vector<8x512xf32>
      %103 = vector.broadcast %7 : f32 to vector<8x512xf32>
      %104 = arith.mulf %103, %102 : vector<8x512xf32>
      %105 = arith.addf %92, %104 : vector<8x512xf32>
      %106 = vector.broadcast %16 : f32 to vector<8x512xf32>
      %107 = arith.mulf %106, %102 : vector<8x512xf32>
      %108 = arith.addf %95, %107 : vector<8x512xf32>
      %109 = vector.broadcast %25 : f32 to vector<8x512xf32>
      %110 = arith.mulf %109, %102 : vector<8x512xf32>
      %111 = arith.addf %98, %110 : vector<8x512xf32>
      %112 = vector.broadcast %34 : f32 to vector<8x512xf32>
      %113 = arith.mulf %112, %102 : vector<8x512xf32>
      %114 = arith.addf %101, %113 : vector<8x512xf32>
      %115 = vector.extract_strided_slice %53 {offsets = [0, 5], sizes = [8, 512], strides = [1, 1]} : vector<8x520xf32> to vector<8x512xf32>
      %116 = vector.broadcast %8 : f32 to vector<8x512xf32>
      %117 = arith.mulf %116, %115 : vector<8x512xf32>
      %118 = arith.addf %105, %117 : vector<8x512xf32>
      %119 = vector.broadcast %17 : f32 to vector<8x512xf32>
      %120 = arith.mulf %119, %115 : vector<8x512xf32>
      %121 = arith.addf %108, %120 : vector<8x512xf32>
      %122 = vector.broadcast %26 : f32 to vector<8x512xf32>
      %123 = arith.mulf %122, %115 : vector<8x512xf32>
      %124 = arith.addf %111, %123 : vector<8x512xf32>
      %125 = vector.broadcast %35 : f32 to vector<8x512xf32>
      %126 = arith.mulf %125, %115 : vector<8x512xf32>
      %127 = arith.addf %114, %126 : vector<8x512xf32>
      %128 = vector.extract_strided_slice %53 {offsets = [0, 6], sizes = [8, 512], strides = [1, 1]} : vector<8x520xf32> to vector<8x512xf32>
      %129 = vector.broadcast %9 : f32 to vector<8x512xf32>
      %130 = arith.mulf %129, %128 : vector<8x512xf32>
      %131 = arith.addf %118, %130 : vector<8x512xf32>
      %132 = vector.broadcast %18 : f32 to vector<8x512xf32>
      %133 = arith.mulf %132, %128 : vector<8x512xf32>
      %134 = arith.addf %121, %133 : vector<8x512xf32>
      %135 = vector.broadcast %27 : f32 to vector<8x512xf32>
      %136 = arith.mulf %135, %128 : vector<8x512xf32>
      %137 = arith.addf %124, %136 : vector<8x512xf32>
      %138 = vector.broadcast %36 : f32 to vector<8x512xf32>
      %139 = arith.mulf %138, %128 : vector<8x512xf32>
      %140 = arith.addf %127, %139 : vector<8x512xf32>
      %141 = vector.extract_strided_slice %53 {offsets = [0, 7], sizes = [8, 512], strides = [1, 1]} : vector<8x520xf32> to vector<8x512xf32>
      %142 = vector.broadcast %10 : f32 to vector<8x512xf32>
      %143 = arith.mulf %142, %141 : vector<8x512xf32>
      %144 = arith.addf %131, %143 : vector<8x512xf32>
      %145 = vector.broadcast %19 : f32 to vector<8x512xf32>
      %146 = arith.mulf %145, %141 : vector<8x512xf32>
      %147 = arith.addf %134, %146 : vector<8x512xf32>
      %148 = vector.broadcast %28 : f32 to vector<8x512xf32>
      %149 = arith.mulf %148, %141 : vector<8x512xf32>
      %150 = arith.addf %137, %149 : vector<8x512xf32>
      %151 = vector.broadcast %37 : f32 to vector<8x512xf32>
      %152 = arith.mulf %151, %141 : vector<8x512xf32>
      %153 = arith.addf %140, %152 : vector<8x512xf32>
      %154 = vector.broadcast %11 : f32 to vector<8x512xf32>
      %155 = arith.mulf %154, %48 : vector<8x512xf32>
      %156 = arith.addf %144, %155 : vector<8x512xf32>
      %157 = vector.broadcast %20 : f32 to vector<8x512xf32>
      %158 = arith.mulf %157, %48 : vector<8x512xf32>
      %159 = arith.addf %147, %158 : vector<8x512xf32>
      %160 = vector.broadcast %29 : f32 to vector<8x512xf32>
      %161 = arith.mulf %160, %48 : vector<8x512xf32>
      %162 = arith.addf %150, %161 : vector<8x512xf32>
      %163 = vector.broadcast %38 : f32 to vector<8x512xf32>
      %164 = arith.mulf %163, %48 : vector<8x512xf32>
      %165 = arith.addf %153, %164 : vector<8x512xf32>
      %166 = math.tanh %156 : vector<8x512xf32>
      %167 = vector.broadcast %39 : f32 to vector<8x512xf32>
      %168 = arith.mulf %167, %166 : vector<8x512xf32>
      %169 = math.tanh %159 : vector<8x512xf32>
      %170 = vector.broadcast %40 : f32 to vector<8x512xf32>
      %171 = arith.mulf %170, %169 : vector<8x512xf32>
      %172 = arith.addf %168, %171 : vector<8x512xf32>
      %173 = math.tanh %162 : vector<8x512xf32>
      %174 = vector.broadcast %41 : f32 to vector<8x512xf32>
      %175 = arith.mulf %174, %173 : vector<8x512xf32>
      %176 = arith.addf %172, %175 : vector<8x512xf32>
      %177 = math.tanh %165 : vector<8x512xf32>
      %178 = vector.broadcast %42 : f32 to vector<8x512xf32>
      %179 = arith.mulf %178, %177 : vector<8x512xf32>
      %180 = arith.addf %176, %179 : vector<8x512xf32>
      %c0_11 = arith.constant 0 : index
      %c0_12 = arith.constant 0 : index
      %181 = arith.index_cast %45 : i32 to index
      %c0_13 = arith.constant 0 : index
      %c0_14 = arith.constant 0 : index
      %182 = vector.load %arg4[%c0_11, %c0_12, %181, %c0_13, %c0_14] : memref<1x1x16x8x512xf32, #tpu.memory_space<vmem>>, vector<1x1x1x8x512xf32>
      %183 = vector.shape_cast %182 : vector<1x1x1x8x512xf32> to vector<8x512xf32>
      %184 = vector.shape_cast %180 : vector<8x512xf32> to vector<1x1x1x8x512xf32>
      tpu.vector_store %arg4[%c0_11, %c0_12, %181, %c0_13, %c0_14], %184 {strides = array<i32>} : memref<1x1x16x8x512xf32, #tpu.memory_space<vmem>>, vector<1x1x1x8x512xf32>,
      %185 = vector.extract_strided_slice %49 {offsets = [7, 0], sizes = [1, 8], strides = [1, 1]} : vector<8x8xf32> to vector<1x8xf32>
      %c0_15 = arith.constant 0 : index
      %c0_16 = arith.constant 0 : index
      %186 = vector.load %arg5[%c0_15, %c0_16] : memref<1x8xf32, #tpu.memory_space<vmem>>, vector<1x8xf32>
      tpu.vector_store %arg5[%c0_15, %c0_16], %185 {strides = array<i32>} : memref<1x8xf32, #tpu.memory_space<vmem>>, vector<1x8xf32>,
    }
    %c16_i32_2 = arith.constant 16 : i32
    return
  }
  func.func @transform_0(%arg0: i32, %arg1: i32) -> i32 {
    %c0_i32 = arith.constant 0 : i32
    %c0_i32_0 = arith.constant 0 : i32
    return %c0_i32 : i32
  }
  func.func @transform_1(%arg0: i32, %arg1: i32) -> (i32, i32, i32, i32, i32) {
    %c0_i32 = arith.constant 0 : i32
    %c0_i32_0 = arith.constant 0 : i32
    %c0_i32_1 = arith.constant 0 : i32
    %c0_i32_2 = arith.constant 0 : i32
    return %arg0, %arg1, %c0_i32, %c0_i32_0, %c0_i32_1 : i32, i32, i32, i32, i32
  }
  func.func @transform_2(%arg0: i32, %arg1: i32) -> (i32, i32, i32, i32, i32) {
    %c0_i32 = arith.constant 0 : i32
    %c0_i32_0 = arith.constant 0 : i32
    %c0_i32_1 = arith.constant 0 : i32
    %c0_i32_2 = arith.constant 0 : i32
    return %arg0, %arg1, %c0_i32, %c0_i32_0, %c0_i32_1 : i32, i32, i32, i32, i32
  }
}

</mosaic_0001>

<bundles_post_ra>
// kernel: tpu_custom_call.1
= control target key start
LH: loop header
LB: loop body
LE: loop exit
PB: predicated region body
PF: predicated region fallthrough
CT: control target
= control target key end

     0   :  { %s3053_s0 = inlined_call_operand.hbm [shape: f32[40], index: 0, kind: input, shape index: {}]   ;;  %s3054_s1 = inlined_call_operand.hbm [shape: f32[2,1,16,8,512], index: 1, kind: input, shape index: {}]   ;;  %s3055_s2 = inlined_call_operand.hbm [shape: f32[2,1,16,8,512], index: 2, kind: output, shape index: {}]  }
   0x1   :  { %3082 = sst [smem:[#allocation46_spill]] %s3053_s0 }
   0x2   :  { %3083 = sst [smem:[#allocation47_spill]] %s3054_s1 }
   0x3   :  { %3084 = sst [smem:[#allocation48_spill]] %s3055_s2 }
   0x4   :  { %7 = vsyncpa [#allocation6], 0 }
   0x5   :  { %8 = vsyncpa [#allocation4], 0 }
   0x6   :  { %10 = vsyncpa [#allocation4 + $0x1], 0 }
   0x7   :  { %11 = vsyncpa [#allocation5], 0 }
   0x8   :  { %13 = vsyncpa [#allocation5 + $0x1], 0  ;;  %s1810_s9 = smov 0   ;;  %s1812_s10 = smov 0  }
   0x9   :  { %s1814_s11 = smov 0   ;;  %s1816_s12 = smov 0  }
   0xa   :  { %s1818_s13 = smov 0   ;;  %s1820_s14 = smov 0  }
   0xb LB: > { %3085 = sst [smem:[#allocation12_spill]] %s1753_s9  ;;  %s1447_s15 = sadd.s32 4294967295, %s1773_s14   ;;  %s1773_s14 = sphi %s1820_s14, %s19_s14   ;;  %s1769_s13 = sphi %s1818_s13, %s3172_s13   ;;  %s1765_s12 = sphi %s1816_s12, %s3171_s12   ;;  %s1761_s11 = sphi %s1814_s11, %s3170_s11   ;;  %s1757_s10 = sphi %s1812_s10, %s3169_s10   ;;  %s1753_s9 = sphi %s1810_s9, %s3168_s9  }
   0xc   : > { %3086 = sst [smem:[#allocation13_spill]] %s1757_s10  ;;  %s1448_s16 = sadd.s32 4294967294, %s1773_s14  }
   0xd   : > { %3087 = sst [smem:[#allocation14_spill]] %s1761_s11  ;;  %s61_s17 = sadd.s32 1, %s1761_s11 }
   0xe   : > { %3088 = sst [smem:[#allocation15_spill]] %s1765_s12  ;;  %p68_p0 = scmp.ne.s32.totalorder %s1761_s11, %s1757_s10 }
   0xf   : > { %3089 = sst [smem:[#allocation16_spill]] %s1769_s13  ;;  %p69_p1 = scmp.eq.s32.totalorder %s1773_s14, 0 }
  0x10   : > { %3090 = sst [smem:[#allocation17_spill]] %s1773_s14  ;;  %p74_p2 = scmp.ne.s32.totalorder %s1757_s10, %s1753_s9 }
  0x11   : > { %p1848_p3 = scmp.eq.s32.totalorder %s1447_s15, 0  ;;  %p100_p4 = scmp.eq.s32.totalorder %s1447_s15, 1 }
  0x12   : > { %p70_p5 = por %p69_p1, %p68_p0  ;;  %p106_p6 = scmp.eq.s32.totalorder %s1448_s16, 1 }
  0x13   : > { %s3091_s18 = scalar_select %p1848_p3, 1, 0 }
  0x14   : > { %p1854_p7 = por %p1848_p3, %p74_p2  ;;  %p1858_p8 = por %p100_p4, %p68_p0 }
  0x15   : > { %p1862_p9 = por %p106_p6, %p74_p2  ;;  %p1449_p10 = scmp.ge.s32.totalorder %s1773_s14, 1 }
  0x16   : > { %s3092_s19 = scalar_select %p1854_p7, 1, 0 }
  0x17   : > { %s3093_s20 = scalar_select %p1858_p8, 1, 0 }
  0x18   : > { %s3095_s21 = scalar_select %p1862_p9, 1, 0 }
  0x19   : > { %3094 = sst [smem:[#allocation18_spill]] %s3093_s20  ;;  %p113_p11 = scmp.lt.s32.totalorder %s1773_s14, 3 }
  0x1a   : > { %3096 = sst [smem:[#allocation19_spill]] %s3095_s21  ;;  %p1531_p1 = scmp.lt.s32.totalorder %s1773_s14, 2 }
  0x1b   : > { %p1869_p13 = pnand %p1449_p10, %p113_p11  ;;  %s135_s23 = sand.u32 1, %s1761_s11  }
  0x1c   : > { %p1877_p0 = pnand %p1531_p1, %p70_p5  ;;  %s31_s25 = sadd.s32 1, %s1769_s13 }
  0x1d   : > { %p1518_p7 = pneg %p1869_p13  ;;  %s1452_s26 = sshll.u32 %s135_s23, 9 }
  0x1e   : > { %p33_p4 = scmp.ge.s32.totalorder %s31_s25, 2  ;;  %s3099_s0 = sld [smem:[#allocation46_spill]] }
  0x1f   : > { %p1519_p2 = pnand %p1518_p7, %p1848_p3 }
  0x21   : > { %p1642_p10 = pneg %p1519_p2 }
  0x24   : > { %s1640_s29 = scalar_lea.hbm %s3099_s0, 16 }
  0x25   : > { %p1641_p6 = scmp.ne.s32.totalorder %s3099_s0, %s1640_s29  ;;  %p1647_p5 = scmp.lt.u32.totalorder %s1640_s29, %s3099_s0 }
  0x27   : > { %p1643_p11 = pnand %p1642_p10, %p1641_p6 }
  0x29   : > { %p1644_p12 = pneg %p1643_p11 }
  0x2b   : > { %p1649_p1 = pnand %p1647_p5, %p1644_p12 }
  0x2d   : > { %1652 = shalt.err (!%p1649_p1)
}
  0x2e   : > { %s1779_s6 = smov [#allocation3]   ;;  %s3174_s25 = smov (%p33_p4, %s31_s25), 0 }
  0x2f   : > { %1521 = dma.hbm_to_smem (!%p1519_p2), %s3099_s0, 16, %s1779_s6, [#allocation6]  }
  0x30   : > { %3100 = sst [smem:[#allocation20_spill]] %s3174_s25  ;;  %s1506_s15 = sshll.u32 %s1769_s13, 13 }
  0x31   : > { %s56_s16 = ssub.s32 %s1769_s13, %s3174_s25  ;;  %s3101_s1 = sld [smem:[#allocation47_spill]] }
  0x32   : > { %p59_p7 = scmp.eq.s32.totalorder %s56_s16, 0  ;;  %s139_s30 = scalar_lea.vmem [#allocation7], %s1452_s26 }
  0x33   : > { %s148_s3 = sshll.u32 %s139_s30, 4  ;;  %s1913_s5 = scalar_lea.sflag [#allocation4], %s135_s23  ;;  %s1906_s3 = int_to_ptr.vmem [resolvable:$true] %s148_s3 }
  0x34   : > { %s1911_s4 = scalar_select %p59_p7, %s1761_s11, %s61_s17  }
  0x35   : > { %p1655_p2 = pneg %p1877_p0 }
  0x36   : > { %3102 = sst [smem:[#allocation21_spill]] %s1911_s4 }
  0x37   : > { %s1904_s29 = scalar_lea.hbm %s3101_s1, %s1506_s15  ;;  %s1658_s26 = scalar_lea.hbm %s3101_s1, 16384 }
  0x38   : > { %s1653_s6 = scalar_lea.hbm %s1904_s29, 8192  ;;  %p1659_p10 = scmp.lt.u32.totalorder %s1904_s29, %s3101_s1 }
  0x39   : > { %p1654_p12 = scmp.ne.s32.totalorder %s1904_s29, %s1653_s6  ;;  %p1660_p11 = scmp.lt.u32.totalorder %s1658_s26, %s1653_s6 }
  0x3a   : > { %p1662_p1 = scmp.lt.u32.totalorder %s1653_s6, %s1904_s29 }
  0x3b   : > { %p1656_p4 = pnand %p1655_p2, %p1654_p12  ;;  %p1661_p5 = por %p1660_p11, %p1659_p10 }
  0x3d   : > { %p1657_p6 = pneg %p1656_p4  ;;  %p1663_p7 = por %p1662_p1, %p1661_p5 }
  0x3f   : > { %p1664_p9 = pnand %p1663_p7, %p1657_p6 }
  0x41   : > { %1667 = shalt.err (!%p1664_p9)
}
  0x42   : > { %s1668_s17 = scalar_lea.vmem %s1906_s3, 8192  ;;  %s1780_s23 = smov [#allocation7]  }
  0x43   : > { %p1669_p12 = scmp.ne.s32.totalorder %s1906_s3, %s1668_s17  ;;  %s1673_s27 = sshll.u32 %s1780_s23, 4  ;;  %s1674_s27 = int_to_ptr.vmem [resolvable:$false] %s1673_s27 }
  0x44   : > { %s1675_s28 = scalar_lea.vmem %s1674_s27, 16384  ;;  %p1676_p3 = scmp.lt.s32.totalorder %s1906_s3, %s1674_s27 }
  0x45   : > { %p1671_p4 = pnand %p1669_p12, %p1655_p2  ;;  %p1677_p10 = scmp.lt.s32.totalorder %s1675_s28, %s1668_s17 }
  0x47   : > { %p1672_p8 = pneg %p1671_p4  ;;  %p1678_p11 = por %p1677_p10, %p1676_p3 }
  0x49   : > { %p1679_p5 = pnand %p1678_p11, %p1672_p8 }
  0x4b   : > { %1682 = shalt.err (!%p1679_p5)
}
  0x4c   : > { %s1781_s30 = smov 512   ;;  %s1782_s6 = smov 32  }
  0x4d   : > { %1525 = dma.hbm_to_vmem [thread:$0]  (!%p1877_p0), %s1904_s29, 8192, %s1906_s3, %s1913_s5, %s1781_s30, %s1781_s30, %s1782_s6  }
  0x4e   : > { %160 = sbr.rel (%p1869_p13) target bundleno = 682 (0x2aa), region = 28 }
  0x55   : > { %p3103_p9 = scmp.ne.s32.totalorder %s3091_s18, 0 }
  0x57   : > { %1740 = dma.done.wait (%p3103_p9), [#allocation6], 16  }
  0x58   : > { %1742 = vsyncadd (%p3103_p9), [#allocation6], 4294967280  ;;  %s1948_s7 = sand.u32 1, %s1757_s10   ;;  %p3104_p3 = scmp.ne.s32.totalorder %s3092_s19, 0 }
  0x59   : > { %s3060_s8 = sshll.u32 %s1948_s7, 9  ;;  %s167_s26 = scalar_lea.sflag [#allocation4], %s1948_s7 }
  0x5a   : > { %s1954_s24 = scalar_lea.vmem [#allocation7], %s3060_s8 }
  0x5b   : > { %1744 = dma.done.wait (%p3104_p3), %s167_s26, 8192  }
  0x5c   : > { %1746 = vsyncadd (%p3104_p3), %s167_s26, 4294959104 }
  0x5d   : > { %175 = sfence }
  0x5e   : > { %vm196_vm0 = vcmask 57344   ;;  %s1960_s18 = sld [smem:[#allocation3]]  ;;  %v1783_v0 = vmov 0.0   ;;  %s1962_s22 = sld [smem:[#allocation3 + $0x1]] }
  0x5f   : > { %197 = vst.msk [vmem:[#allocation2] sm:$0x1] %vm196_vm0, %v1783_v0  ;;  %s1964_s29 = sld [smem:[#allocation3 + $0x2]]  ;;  %s1966_s3 = sld [smem:[#allocation3 + $0x3]] }
  0x60   : > { %s1968_s5 = sld [smem:[#allocation3 + $0x4]]  ;;  %s1970_s15 = sld [smem:[#allocation3 + $0x5]] }
  0x61   : > { %s1972_s16 = sld [smem:[#allocation3 + $0x6]]  ;;  %s1974_s19 = sld [smem:[#allocation3 + $0x7]] }
  0x62   : > { %s1976_s17 = sld [smem:[#allocation3 + $0x8]]  ;;  %s1978_s23 = sld [smem:[#allocation3 + $0x9]] }
  0x63   : > { %s1980_s27 = sld [smem:[#allocation3 + $0xa]]  ;;  %s1982_s28 = sld [smem:[#allocation3 + $0xb]] }
  0x64   : > { %3105 = sst [smem:[#allocation22_spill]] %s1960_s18  ;;  %s1984_s30 = sld [smem:[#allocation3 + $0xc]] }
  0x65   : > { %s1986_s6 = sld [smem:[#allocation3 + $0xd]]  ;;  %s1988_s26 = sld [smem:[#allocation3 + $0xe]] }
  0x66   : > { %s1990_s8 = sld [smem:[#allocation3 + $0xf]]  ;;  %s1992_s0 = sld [smem:[#allocation3 + $0x10]] }
  0x67   : > { %3106 = sst [smem:[#allocation23_spill]] %s1972_s16  ;;  %s1994_s1 = sld [smem:[#allocation3 + $0x11]] }
  0x68   : > { %3107 = sst [smem:[#allocation24_spill]] %s1974_s19  ;;  %s1996_s25 = sld [smem:[#allocation3 + $0x12]] }
  0x69   : > { %3108 = sst [smem:[#allocation25_spill]] %s1976_s17  ;;  %s1998_s13 = sld [smem:[#allocation3 + $0x13]] }
  0x6a   : > { %3109 = sst [smem:[#allocation26_spill]] %s1978_s23  ;;  %s2000_s4 = sld [smem:[#allocation3 + $0x14]] }
  0x6b   : > { %s2002_s11 = sld [smem:[#allocation3 + $0x15]]  ;;  %s2004_s10 = sld [smem:[#allocation3 + $0x16]] }
  0x6c   : > { %3110 = sst [smem:[#allocation27_spill]] %s1990_s8  ;;  %s2008_s21 = sld [smem:[#allocation3 + $0x18]] }
  0x6d   : > { %3111 = sst [smem:[#allocation28_spill]] %s1992_s0  ;;  %s2006_s14 = sld [smem:[#allocation3 + $0x17]] }
  0x6e   : > { %3112 = sst [smem:[#allocation29_spill]] %s1994_s1  ;;  %s2012_s2 = sld [smem:[#allocation3 + $0x1a]] }
  0x6f   : > { %3113 = sst [smem:[#allocation30_spill]] %s1996_s25  ;;  %s2010_s9 = sld [smem:[#allocation3 + $0x19]] }
  0x70   : > { %s2014_s20 = sld [smem:[#allocation3 + $0x1b]]  ;;  %s2016_s12 = sld [smem:[#allocation3 + $0x1c]] }
  0x71   : > { %s2018_s1 = sld [smem:[#allocation3 + $0x1d]]  ;;  %s2020_s17 = sld [smem:[#allocation3 + $0x1e]] }
  0x72   : > { %3115 = sst [smem:[#allocation32_spill]] %s2008_s21  ;;  %s2022_s0 = sld [smem:[#allocation3 + $0x1f]] }
  0x73   : > { %3114 = sst [smem:[#allocation31_spill]] %s2006_s14  ;;  %s2024_s19 = sld [smem:[#allocation3 + $0x20]] }
  0x74   : > { %3117 = sst [smem:[#allocation34_spill]] %s2012_s2  ;;  %s2026_s18 = sld [smem:[#allocation3 + $0x21]] }
  0x75   : > { %3116 = sst [smem:[#allocation33_spill]] %s2010_s9  ;;  %s2028_s21 = sld [smem:[#allocation3 + $0x22]] }
  0x76   : > { %3118 = sst [smem:[#allocation35_spill]] %s2014_s20  ;;  %s2030_s23 = sld [smem:[#allocation3 + $0x23]] }
  0x77   : > { %3119 = sst [smem:[#allocation36_spill]] %s2018_s1  ;;  %s2032_s9 = sld [smem:[#allocation3 + $0x24]] }
  0x78   : > { %3120 = sst [smem:[#allocation37_spill]] %s2022_s0  ;;  %s2034_s2 = sld [smem:[#allocation3 + $0x25]] }
  0x79   : > { %s2036_s8 = sld [smem:[#allocation3 + $0x26]]  ;;  %s2038_s16 = sld [smem:[#allocation3 + $0x27]] }
  0x7a   : > { %s3123_s20 = sshll.u32 %s1948_s7, 9  ;;  %s2044_s14 = smov 0  }
  0x7b   : > { %s2042_s25 = scalar_lea.vmem [#allocation8], %s3123_s20 }
  0x7c   : > { %3121 = sst [smem:[#allocation38_spill]] %s2030_s23 }
  0x7e   : > { %3122 = sst [smem:[#allocation39_spill]] %s2034_s2 }
  0x7f LB: >> { %s3072_s23 = sshll.u32 %s1777_s14, 5  ;;  %s1784_s20 = smov 8   ;;  %v251_v7 = vld [vmem:[#allocation2] sm:$0x1]  ;;  %vm257_vm1 = vcmask 1040384   ;;  %vm270_vm2 = vcmask 64512   ;;  %v2065_v12 = vstv %s1980_s27  ;;  %v300_v13 = vstv %s1962_s22  ;;  %s1777_s14 = sphi %s2044_s14, %s243_s14  }
  0x80   : >> { %s2053_s2 = scalar_lea.vmem %s1954_s24, %s3072_s23 [#allocation7]  ;;  %vm1321_vm3 = vcmask 64519   ;;  %s3124_s1 = sld [smem:[#allocation36_spill]]  ;;  %v2075_v16 = vstv %s2016_s12  ;;  %v367_v17 = vstv %s1998_s13  ;;  %v2082_v20 = vstv %s1982_s28 }
  0x81   : >> { %v248_v1 = vld [vmem:[%s2053_s2 + $0x8] sm:$0xff]  ;;  %v247_v2 = vld [vmem:[%s2053_s2] sm:$0xff]  ;;  %v250_v3 = vld [vmem:[%s2053_s2 + $0x18] sm:$0xff]  ;;  %v2085_v21 = vstv %s1964_s29  ;;  %s3075_s23 = smov 126   ;;  %s3131_s0 = sld [smem:[#allocation37_spill]]  ;;  %vm321_vm4 = vcmask 1039360  }
  0x82   : >> { %264 = vrot.lane.b32.xlu1 %v248_v1, %s1784_s20  ;;  %262 = vrot.lane.b32.xlu0 %v247_v2, %s1784_s20  ;;  %v253_v4 = vrot.slane %v250_v3, 7  ;;  %v249_v5 = vld [vmem:[%s2053_s2 + $0x10] sm:$0xff]  ;;  %v2091_v23 = vstv %s2000_s4  ;;  %vm454_vm5 = vcmask 1031168   ;;  %vm587_vm6 = vcmask 1022976  }
  0x83   : >> { %v2094_v24 = vstv %s1984_s30  ;;  %v2097_v25 = vstv %s1966_s3  ;;  %v2106_v28 = vstv %s2002_s11  ;;  %vm720_vm7 = vcmask 1014784  }
  0x84   : >> { %vm853_vm8 = vcmask 1006592   ;;  %vm986_vm9 = vcmask 998400   ;;  %vm1119_vm10 = vcmask 990208  }
  0x86   : >> { %254 = vrot.lane.b32.xlu0 %v253_v4, %s1784_s20  ;;  %266 = vrot.lane.b32.xlu1 %v249_v5, %s1784_s20  ;;  %v2088_v22 = vstv %s3124_s1  ;;  %s3127_s1 = smov 125  }
  0x8a   : >> { %268 = vrot.lane.b32.xlu0 %v250_v3, %s1784_s20  ;;  %s3073_s20 = smov 127  }
  0xf4   : >> { %v263_v6 = vpop.permute.xlu0 %262  ;;  %v265_v42 = vpop.permute.xlu1 %264 }
  0xf5   : >> { %v2163_v45 = vsel %vm270_vm2, %v263_v6, %v265_v42 }
  0xf6   : >> { %v302_v47 = vmul.f32 %v300_v13, %v2163_v45  ;;  %v336_v53 = vmul.f32 %v2065_v12, %v2163_v45  ;;  %v369_v56 = vmul.f32 %v367_v17, %v2163_v45  ;;  %v402_v59 = vmul.f32 %v2075_v16, %v2163_v45 }
  0xf7   : >> { %v435_v62 = vmul.f32 %v2085_v21, %v2163_v45  ;;  %v469_v1 = vmul.f32 %v2082_v20, %v2163_v45  ;;  %v502_v4 = vmul.f32 %v2091_v23, %v2163_v45 }
  0xf8   : >> { %v255_v8 = vpop.permute.xlu0 %254  ;;  %v267_v46 = vpop.permute.xlu1 %266 }
  0xf9   : >> { %v258_v9 = vsel %vm257_vm1, %v251_v7, %v255_v8  ;;  %v2171_v49 = vsel %vm270_vm2, %v265_v42, %v267_v46  ;;  %v535_v7 = vmul.f32 %v2088_v22, %v2163_v45 }
  0xfa   : >> { %v2060_v10 = vsel %vm270_vm2, %v258_v9, %v263_v6  ;;  %v303_v51 = vmul.f32 %v300_v13, %v2171_v49  ;;  %v337_v54 = vmul.f32 %v2065_v12, %v2171_v49  ;;  %v370_v57 = vmul.f32 %v367_v17, %v2171_v49 }
  0xfb   : >> { %v2110_v29 = vmul.f32 %v2065_v12, %v2060_v10  ;;  %v2113_v30 = vmul.f32 %v300_v13, %v2060_v10  ;;  %v2117_v31 = vmul.f32 %v2075_v16, %v2060_v10  ;;  %v2120_v32 = vmul.f32 %v367_v17, %v2060_v10 }
  0xfc   : >> { %v2062_v11 = vpop.permute.xlu0 %268  ;;  %v2124_v33 = vmul.f32 %v2082_v20, %v2060_v10  ;;  %v2128_v34 = vmul.f32 %v2085_v21, %v2060_v10  ;;  %v2132_v35 = vmul.f32 %v2088_v22, %v2060_v10  ;;  %v2136_v36 = vmul.f32 %v2091_v23, %v2060_v10 }
  0xfd   : >> { %1322 = vst.msk [vmem:[#allocation2 - $0x7] sm:$0x80] %vm1321_vm3, %v2062_v11  ;;  %v339_v14 = vmul.f32 %v2065_v12, %v2062_v11  ;;  %v305_v15 = vmul.f32 %v300_v13, %v2062_v11  ;;  %v405_v18 = vmul.f32 %v2075_v16, %v2062_v11  ;;  %v372_v19 = vmul.f32 %v367_v17, %v2062_v11 }
  0xfe   : >> { %v472_v26 = vmul.f32 %v2082_v20, %v2062_v11  ;;  %v438_v27 = vmul.f32 %v2085_v21, %v2062_v11  ;;  %v2140_v37 = vmul.f32 %v2094_v24, %v2060_v10  ;;  %v2144_v38 = vmul.f32 %v2097_v25, %v2060_v10 }
  0xff   : >> { %353 = vrot.lane.b32.xlu0 %v339_v14, %s3073_s20  ;;  %319 = vrot.lane.b32.xlu1 %v305_v15, %s3073_s20  ;;  %v2148_v39 = vmul.f32 %v2106_v28, %v2060_v10  ;;  %v538_v40 = vmul.f32 %v2088_v22, %v2062_v11  ;;  %v505_v41 = vmul.f32 %v2091_v23, %v2062_v11 }
 0x100   : >> { %v605_v43 = vmul.f32 %v2094_v24, %v2062_v11  ;;  %v571_v44 = vmul.f32 %v2097_v25, %v2062_v11  ;;  %v638_v48 = vmul.f32 %v2106_v28, %v2062_v11  ;;  %v2175_v50 = vsel %vm270_vm2, %v267_v46, %v2062_v11 }
 0x101   : >> { %v304_v52 = vmul.f32 %v300_v13, %v2175_v50  ;;  %v338_v55 = vmul.f32 %v2065_v12, %v2175_v50  ;;  %v371_v58 = vmul.f32 %v367_v17, %v2175_v50  ;;  %v403_v60 = vmul.f32 %v2075_v16, %v2171_v49 }
 0x102   : >> { %v404_v61 = vmul.f32 %v2075_v16, %v2175_v50  ;;  %v436_v63 = vmul.f32 %v2085_v21, %v2171_v49  ;;  %v437_v0 = vmul.f32 %v2085_v21, %v2175_v50  ;;  %v470_v2 = vmul.f32 %v2082_v20, %v2171_v49 }
 0x103   : >> { %419 = vrot.lane.b32.xlu0 %v405_v18, %s3073_s20  ;;  %386 = vrot.lane.b32.xlu1 %v372_v19, %s3073_s20  ;;  %s3077_s20 = smov 125   ;;  %v471_v3 = vmul.f32 %v2082_v20, %v2175_v50  ;;  %v503_v5 = vmul.f32 %v2091_v23, %v2171_v49  ;;  %v504_v6 = vmul.f32 %v2091_v23, %v2175_v50  ;;  %v666_v21 = vstv %s2020_s17 }
 0x104   : >> { %v536_v8 = vmul.f32 %v2088_v22, %v2171_v49  ;;  %v537_v9 = vmul.f32 %v2088_v22, %v2175_v50  ;;  %v568_v12 = vmul.f32 %v2097_v25, %v2163_v45  ;;  %v569_v13 = vmul.f32 %v2097_v25, %v2171_v49 }
 0x105   : >> { %v570_v14 = vmul.f32 %v2097_v25, %v2175_v50  ;;  %v602_v15 = vmul.f32 %v2094_v24, %v2163_v45  ;;  %v603_v16 = vmul.f32 %v2094_v24, %v2171_v49  ;;  %v604_v17 = vmul.f32 %v2094_v24, %v2175_v50 }
 0x106   : >> { %v635_v18 = vmul.f32 %v2106_v28, %v2163_v45  ;;  %v636_v19 = vmul.f32 %v2106_v28, %v2171_v49  ;;  %v637_v20 = vmul.f32 %v2106_v28, %v2175_v50  ;;  %v668_v22 = vmul.f32 %v666_v21, %v2163_v45 }
 0x107   : >> { %486 = vrot.lane.b32.xlu0 %v472_v26, %s3075_s23  ;;  %452 = vrot.lane.b32.xlu1 %v438_v27, %s3075_s23  ;;  %v669_v23 = vmul.f32 %v666_v21, %v2171_v49  ;;  %v670_v24 = vmul.f32 %v666_v21, %v2175_v50  ;;  %v667_v25 = vmul.f32 %v666_v21, %v2060_v10 }
 0x108   : >> { %v671_v28 = vmul.f32 %v666_v21, %v2062_v11 }
 0x10b   : >> { %552 = vrot.lane.b32.xlu0 %v538_v40, %s3075_s23  ;;  %519 = vrot.lane.b32.xlu1 %v505_v41, %s3075_s23  ;;  %s3125_s23 = smov 127  }
 0x10f   : >> { %619 = vrot.lane.b32.xlu0 %v605_v43, %s3077_s20  ;;  %585 = vrot.lane.b32.xlu1 %v571_v44, %s3077_s20 }
 0x113   : >> { %313 = vrot.lane.b32.xlu0 %v302_v47, %s3125_s23  ;;  %652 = vrot.lane.b32.xlu1 %v638_v48, %s3077_s20  ;;  %s3126_s20 = smov 126  }
 0x117   : >> { %315 = vrot.lane.b32.xlu1 %v303_v51, %s3125_s23  ;;  %317 = vrot.lane.b32.xlu0 %v304_v52, %s3125_s23 }
 0x11b   : >> { %347 = vrot.lane.b32.xlu1 %v336_v53, %s3125_s23  ;;  %349 = vrot.lane.b32.xlu0 %v337_v54, %s3125_s23  ;;  %v766_v54 = vstv %s2004_s10 }
 0x11f   : >> { %351 = vrot.lane.b32.xlu1 %v338_v55, %s3125_s23  ;;  %380 = vrot.lane.b32.xlu0 %v369_v56, %s3125_s23 }
 0x123   : >> { %382 = vrot.lane.b32.xlu1 %v370_v57, %s3125_s23  ;;  %384 = vrot.lane.b32.xlu0 %v371_v58, %s3125_s23  ;;  %v767_v57 = vmul.f32 %v766_v54, %v2060_v10  ;;  %v768_v58 = vmul.f32 %v766_v54, %v2163_v45 }
 0x127   : >> { %413 = vrot.lane.b32.xlu1 %v402_v59, %s3125_s23  ;;  %415 = vrot.lane.b32.xlu0 %v403_v60, %s3125_s23 }
 0x12b   : >> { %417 = vrot.lane.b32.xlu1 %v404_v61, %s3125_s23  ;;  %446 = vrot.lane.b32.xlu0 %v435_v62, %s3126_s20  ;;  %v769_v61 = vmul.f32 %v766_v54, %v2171_v49  ;;  %v770_v62 = vmul.f32 %v766_v54, %v2175_v50 }
 0x12f   : >> { %448 = vrot.lane.b32.xlu1 %v436_v63, %s3126_s20  ;;  %450 = vrot.lane.b32.xlu0 %v437_v0, %s3126_s20  ;;  %v799_v63 = vstv %s3131_s0  ;;  %s3136_s0 = sld [smem:[#allocation23_spill]] }
 0x133   : >> { %480 = vrot.lane.b32.xlu1 %v469_v1, %s3126_s20  ;;  %482 = vrot.lane.b32.xlu0 %v470_v2, %s3126_s20  ;;  %v771_v2 = vmul.f32 %v766_v54, %v2062_v11 }
 0x137   : >> { %484 = vrot.lane.b32.xlu1 %v471_v3, %s3126_s20  ;;  %513 = vrot.lane.b32.xlu0 %v502_v4, %s3126_s20  ;;  %v800_v3 = vmul.f32 %v799_v63, %v2060_v10 }
 0x13b   : >> { %515 = vrot.lane.b32.xlu1 %v503_v5, %s3126_s20  ;;  %517 = vrot.lane.b32.xlu0 %v504_v6, %s3126_s20  ;;  %v801_v6 = vmul.f32 %v799_v63, %v2163_v45 }
 0x13f   : >> { %546 = vrot.lane.b32.xlu1 %v535_v7, %s3126_s20  ;;  %548 = vrot.lane.b32.xlu0 %v536_v8, %s3126_s20  ;;  %v802_v7 = vmul.f32 %v799_v63, %v2171_v49 }
 0x143   : >> { %550 = vrot.lane.b32.xlu1 %v537_v9, %s3126_s20  ;;  %579 = vrot.lane.b32.xlu0 %v568_v12, %s3127_s1  ;;  %v803_v12 = vmul.f32 %v799_v63, %v2175_v50 }
 0x147   : >> { %581 = vrot.lane.b32.xlu1 %v569_v13, %s3127_s1  ;;  %583 = vrot.lane.b32.xlu0 %v570_v14, %s3127_s1  ;;  %v804_v13 = vmul.f32 %v799_v63, %v2062_v11  ;;  %v832_v14 = vstv %s1970_s15 }
 0x148   : >> { %v835_v21 = vmul.f32 %v832_v14, %v2171_v49 }
 0x14b   : >> { %613 = vrot.lane.b32.xlu1 %v602_v15, %s3127_s1  ;;  %615 = vrot.lane.b32.xlu0 %v603_v16, %s3127_s1 }
 0x14f   : >> { %617 = vrot.lane.b32.xlu1 %v604_v17, %s3127_s1  ;;  %646 = vrot.lane.b32.xlu0 %v635_v18, %s3127_s1  ;;  %v833_v17 = vmul.f32 %v832_v14, %v2060_v10  ;;  %v834_v18 = vmul.f32 %v832_v14, %v2163_v45 }
 0x153   : >> { %648 = vrot.lane.b32.xlu1 %v636_v19, %s3127_s1  ;;  %650 = vrot.lane.b32.xlu0 %v637_v20, %s3127_s1 }
 0x157   : >> { %679 = vrot.lane.b32.xlu1 %v668_v22, %s3127_s1  ;;  %681 = vrot.lane.b32.xlu0 %v669_v23, %s3127_s1  ;;  %v836_v22 = vmul.f32 %v832_v14, %v2175_v50  ;;  %v866_v23 = vstv %s1988_s26 }
 0x15b   : >> { %683 = vrot.lane.b32.xlu1 %v670_v24, %s3127_s1  ;;  %345 = vrot.lane.b32.xlu0 %v2110_v29, %s3125_s23  ;;  %v699_v29 = vstv %s1968_s5 }
 0x15c   : >> { %v704_v41 = vmul.f32 %v699_v29, %v2062_v11 }
 0x15f   : >> { %311 = vrot.lane.b32.xlu1 %v2113_v30, %s3125_s23  ;;  %411 = vrot.lane.b32.xlu0 %v2117_v31, %s3125_s23 }
 0x163   : >> { %378 = vrot.lane.b32.xlu1 %v2120_v32, %s3125_s23  ;;  %478 = vrot.lane.b32.xlu0 %v2124_v33, %s3126_s20  ;;  %v700_v32 = vmul.f32 %v699_v29, %v2060_v10  ;;  %v701_v33 = vmul.f32 %v699_v29, %v2163_v45  ;;  %s1788_s23 = smov 124  }
 0x167   : >> { %444 = vrot.lane.b32.xlu1 %v2128_v34, %s3126_s20  ;;  %544 = vrot.lane.b32.xlu0 %v2132_v35, %s3126_s20 }
 0x16b   : >> { %511 = vrot.lane.b32.xlu1 %v2136_v36, %s3126_s20  ;;  %611 = vrot.lane.b32.xlu0 %v2140_v37, %s3127_s1  ;;  %v702_v36 = vmul.f32 %v699_v29, %v2171_v49  ;;  %v703_v37 = vmul.f32 %v699_v29, %v2175_v50  ;;  %s3132_s20 = sld [smem:[#allocation31_spill]]  ;;  %v867_v29 = vmul.f32 %v866_v23, %v2060_v10 }
 0x16f   : >> { %577 = vrot.lane.b32.xlu1 %v2144_v38, %s3127_s1  ;;  %677 = vrot.lane.b32.xlu0 %v667_v25, %s3127_s1  ;;  %v733_v38 = vstv %s1986_s6 }
 0x170   : >> { %v734_v42 = vmul.f32 %v733_v38, %v2060_v10  ;;  %v735_v46 = vmul.f32 %v733_v38, %v2163_v45  ;;  %v736_v47 = vmul.f32 %v733_v38, %v2171_v49  ;;  %v737_v52 = vmul.f32 %v733_v38, %v2175_v50 }
 0x171   : >> { %v2299_v26 = vpop.permute.xlu0 %353  ;;  %v2301_v27 = vpop.permute.xlu1 %319  ;;  %v738_v53 = vmul.f32 %v733_v38, %v2062_v11 }
 0x172   : >> { %3128 = vst [vmem:[#allocation40_spill] sm:$0xff] %v2299_v26 }
 0x173   : >> { %644 = vrot.lane.b32.xlu1 %v2148_v39, %s3127_s1  ;;  %685 = vrot.lane.b32.xlu0 %v671_v28, %s3127_s1  ;;  %s1789_s1 = smov 123   ;;  %v837_v28 = vmul.f32 %v832_v14, %v2062_v11 }
 0x175   : >> { %v2308_v30 = vpop.permute.xlu0 %419  ;;  %v2310_v31 = vpop.permute.xlu1 %386 }
 0x177   : >> { %710 = vrot.lane.b32.xlu1 %v700_v32, %s1788_s23  ;;  %712 = vrot.lane.b32.xlu0 %v701_v33, %s1788_s23 }
 0x179   : >> { %v2316_v34 = vpop.permute.xlu0 %486  ;;  %v2318_v35 = vpop.permute.xlu1 %452 }
 0x17a   : >> { %3129 = vst [vmem:[#allocation41_spill] sm:$0xff] %v2316_v34 }
 0x17b   : >> { %714 = vrot.lane.b32.xlu1 %v702_v36, %s1788_s23  ;;  %716 = vrot.lane.b32.xlu0 %v703_v37, %s1788_s23  ;;  %v868_v36 = vmul.f32 %v866_v23, %v2163_v45  ;;  %v869_v37 = vmul.f32 %v866_v23, %v2171_v49 }
 0x17d   : >> { %v2325_v39 = vpop.permute.xlu0 %552  ;;  %v2327_v40 = vpop.permute.xlu1 %519 }
 0x17f   : >> { %718 = vrot.lane.b32.xlu1 %v704_v41, %s1788_s23  ;;  %744 = vrot.lane.b32.xlu0 %v734_v42, %s1788_s23  ;;  %v870_v42 = vmul.f32 %v866_v23, %v2175_v50 }
 0x181   : >> { %v2333_v43 = vpop.permute.xlu0 %619  ;;  %v2335_v44 = vpop.permute.xlu1 %585 }
 0x182   : >> { %3130 = vst [vmem:[#allocation42_spill] sm:$0xff] %v2333_v43 }
 0x183   : >> { %746 = vrot.lane.b32.xlu1 %v735_v46, %s1788_s23  ;;  %748 = vrot.lane.b32.xlu0 %v736_v47, %s1788_s23  ;;  %v871_v46 = vmul.f32 %v866_v23, %v2062_v11  ;;  %v899_v47 = vstv %s3132_s20  ;;  %s3135_s20 = sld [smem:[#allocation35_spill]]  ;;  %v965_v23 = vstv %s3136_s0  ;;  %s1790_s0 = smov 122  }
 0x184   : >> { %v900_v54 = vmul.f32 %v899_v47, %v2060_v10  ;;  %v903_v63 = vmul.f32 %v899_v47, %v2175_v50  ;;  %v968_v43 = vmul.f32 %v965_v23, %v2171_v49 }
 0x185   : >> { %v2341_v48 = vpop.permute.xlu0 %313  ;;  %v2343_v51 = vpop.permute.xlu1 %652 }
 0x187   : >> { %750 = vrot.lane.b32.xlu1 %v737_v52, %s1788_s23  ;;  %752 = vrot.lane.b32.xlu0 %v738_v53, %s1788_s23 }
 0x189   : >> { %v2350_v55 = vpop.permute.xlu1 %315  ;;  %v2352_v56 = vpop.permute.xlu0 %317 }
 0x18b   : >> { %777 = vrot.lane.b32.xlu1 %v767_v57, %s1788_s23  ;;  %779 = vrot.lane.b32.xlu0 %v768_v58, %s1788_s23  ;;  %v901_v57 = vmul.f32 %v899_v47, %v2163_v45 }
 0x18d   : >> { %v2358_v59 = vpop.permute.xlu1 %347  ;;  %v2360_v60 = vpop.permute.xlu0 %349 }
 0x18f   : >> { %781 = vrot.lane.b32.xlu1 %v769_v61, %s1788_s23  ;;  %783 = vrot.lane.b32.xlu0 %v770_v62, %s1788_s23  ;;  %v902_v62 = vmul.f32 %v899_v47, %v2171_v49 }
 0x191   : >> { %v2367_v0 = vpop.permute.xlu1 %351  ;;  %v2369_v1 = vpop.permute.xlu0 %380 }
 0x193   : >> { %785 = vrot.lane.b32.xlu1 %v771_v2, %s1788_s23  ;;  %810 = vrot.lane.b32.xlu0 %v800_v3, %s1788_s23  ;;  %v2447_v2 = vstv %s2024_s19 }
 0x195   : >> { %v2375_v4 = vpop.permute.xlu1 %382  ;;  %v2377_v5 = vpop.permute.xlu0 %384 }
 0x197   : >> { %812 = vrot.lane.b32.xlu1 %v801_v6, %s1788_s23  ;;  %814 = vrot.lane.b32.xlu0 %v802_v7, %s1788_s23  ;;  %v904_v7 = vmul.f32 %v899_v47, %v2062_v11 }
 0x199   : >> { %v2383_v8 = vpop.permute.xlu1 %413  ;;  %v2385_v9 = vpop.permute.xlu0 %415 }
 0x19b   : >> { %816 = vrot.lane.b32.xlu1 %v803_v12, %s1788_s23  ;;  %818 = vrot.lane.b32.xlu0 %v804_v13, %s1788_s23  ;;  %s3134_s23 = sld [smem:[#allocation30_spill]]  ;;  %v933_v12 = vmul.f32 %v2447_v2, %v2060_v10 }
 0x19d   : >> { %v2392_v15 = vpop.permute.xlu1 %417  ;;  %v2394_v16 = vpop.permute.xlu0 %446 }
 0x19f   : >> { %843 = vrot.lane.b32.xlu1 %v833_v17, %s1789_s1  ;;  %845 = vrot.lane.b32.xlu0 %v834_v18, %s1789_s1  ;;  %v934_v18 = vmul.f32 %v2447_v2, %v2163_v45 }
 0x1a1   : >> { %v2400_v19 = vpop.permute.xlu1 %448  ;;  %v2402_v20 = vpop.permute.xlu0 %450  ;;  %v2459_v13 = vstv %s3134_s23  ;;  %s3139_s23 = sld [smem:[#allocation27_spill]] }
 0x1a3   : >> { %847 = vrot.lane.b32.xlu1 %v835_v21, %s1789_s1  ;;  %849 = vrot.lane.b32.xlu0 %v836_v22, %s1789_s1  ;;  %v935_v21 = vmul.f32 %v2447_v2, %v2171_v49  ;;  %v2470_v22 = vstv %s3135_s20  ;;  %s3140_s20 = sld [smem:[#allocation26_spill]] }
 0x1a4   : >> { %v297_v47 = vmul.f32 %v2470_v22, %v2163_v45 }
 0x1a5   : >> { %v2409_v24 = vpop.permute.xlu1 %480  ;;  %v2411_v25 = vpop.permute.xlu0 %482 }
 0x1a7   : >> { %851 = vrot.lane.b32.xlu1 %v837_v28, %s1789_s1  ;;  %877 = vrot.lane.b32.xlu0 %v867_v29, %s1789_s1  ;;  %v292_v28 = vmul.f32 %v2459_v13, %v2163_v45  ;;  %v293_v29 = vmul.f32 %v2459_v13, %v2171_v49 }
 0x1a9   : >> { %v2417_v32 = vpop.permute.xlu1 %484  ;;  %v2419_v33 = vpop.permute.xlu0 %513 }
 0x1aa   : >> { %3133 = vst [vmem:[#allocation43_spill] sm:$0xff] %v2417_v32 }
 0x1ab   : >> { %879 = vrot.lane.b32.xlu1 %v868_v36, %s1789_s1  ;;  %881 = vrot.lane.b32.xlu0 %v869_v37, %s1789_s1  ;;  %v389_v36 = vsel %vm321_vm4, %v2369_v1, %v2375_v4  ;;  %v294_v37 = vmul.f32 %v2459_v13, %v2175_v50 }
 0x1ad   : >> { %v516_v38 = vpop.permute.xlu1 %515  ;;  %v518_v41 = vpop.permute.xlu0 %517 }
 0x1af   : >> { %883 = vrot.lane.b32.xlu1 %v870_v42, %s1789_s1  ;;  %885 = vrot.lane.b32.xlu0 %v871_v46, %s1789_s1  ;;  %v390_v42 = vsel %vm321_vm4, %v2375_v4, %v2377_v5  ;;  %v391_v46 = vsel %vm321_vm4, %v2377_v5, %v2310_v31  ;;  %v422_v4 = vsel %vm321_vm4, %v2383_v8, %v2385_v9 }
 0x1b0   : >> { %v523_v31 = vsel %vm454_vm5, %v516_v38, %v518_v41  ;;  %v524_v5 = vsel %vm454_vm5, %v518_v41, %v2327_v40  ;;  %v430_v34 = vadd.f32 %v422_v4, %v297_v47  ;;  %v423_v47 = vsel %vm321_vm4, %v2385_v9, %v2392_v15 }
 0x1b1   : >> { %v2430_v52 = vpop.permute.xlu1 %546  ;;  %v2432_v53 = vpop.permute.xlu0 %548 }
 0x1b2   : >> { %v555_v41 = vsel %vm454_vm5, %v2430_v52, %v2432_v53 }
 0x1b3   : >> { %910 = vrot.lane.b32.xlu1 %v900_v54, %s1789_s1  ;;  %912 = vrot.lane.b32.xlu0 %v901_v57, %s1789_s1 }
 0x1b5   : >> { %v2438_v58 = vpop.permute.xlu1 %550  ;;  %v2440_v61 = vpop.permute.xlu0 %579 }
 0x1b7   : >> { %914 = vrot.lane.b32.xlu1 %v902_v62, %s1789_s1  ;;  %916 = vrot.lane.b32.xlu0 %v903_v63, %s1789_s1  ;;  %v966_v62 = vmul.f32 %v965_v23, %v2060_v10  ;;  %v967_v63 = vmul.f32 %v965_v23, %v2163_v45 }
 0x1b9   : >> { %v2449_v3 = vpop.permute.xlu1 %581  ;;  %v2451_v6 = vpop.permute.xlu0 %583 }
 0x1bb   : >> { %918 = vrot.lane.b32.xlu1 %v904_v7, %s1789_s1  ;;  %943 = vrot.lane.b32.xlu0 %v933_v12, %s1789_s1  ;;  %v522_v7 = vsel %vm454_vm5, %v2419_v33, %v516_v38  ;;  %v397_v12 = vadd.f32 %v389_v36, %v292_v28 }
 0x1bd   : >> { %v2461_v14 = vpop.permute.xlu1 %613  ;;  %v2463_v17 = vpop.permute.xlu0 %615 }
 0x1be   : >> { %3137 = vst [vmem:[#allocation44_spill] sm:$0xff] %v2463_v17  ;;  %v530_v17 = vadd.f32 %v522_v7, %v397_v12 }
 0x1bf   : >> { %945 = vrot.lane.b32.xlu1 %v934_v18, %s1789_s1  ;;  %947 = vrot.lane.b32.xlu0 %v935_v21, %s1789_s1  ;;  %v398_v18 = vadd.f32 %v390_v42, %v293_v29  ;;  %v399_v21 = vadd.f32 %v391_v46, %v294_v37 }
 0x1c1   : >> { %v2492_v54 = vpop.permute.xlu1 %617  ;;  %v2494_v57 = vpop.permute.xlu0 %646  ;;  %v531_v38 = vadd.f32 %v523_v31, %v398_v18  ;;  %v532_v32 = vadd.f32 %v524_v5, %v399_v21 }
 0x1c2   : >> { %3138 = vst [vmem:[#allocation45_spill] sm:$0xff] %v2492_v54  ;;  %v969_v54 = vmul.f32 %v965_v23, %v2175_v50 }
 0x1c3   : >> { %976 = vrot.lane.b32.xlu1 %v966_v62, %s1790_s0  ;;  %978 = vrot.lane.b32.xlu0 %v967_v63, %s1790_s0  ;;  %v999_v62 = vstv %s3139_s23  ;;  %s3141_s23 = sld [smem:[#allocation22_spill]] }
 0x1c4   : >> { %v1000_v4 = vmul.f32 %v999_v62, %v2060_v10  ;;  %v1001_v12 = vmul.f32 %v999_v62, %v2163_v45  ;;  %v1002_v18 = vmul.f32 %v999_v62, %v2171_v49 }
 0x1c5   : >> { %v649_v26 = vpop.permute.xlu1 %648  ;;  %v651_v40 = vpop.permute.xlu0 %650 }
 0x1c6   : >> { %v655_v28 = vsel %vm587_vm6, %v2494_v57, %v649_v26  ;;  %v656_v29 = vsel %vm587_vm6, %v649_v26, %v651_v40  ;;  %v657_v36 = vsel %vm587_vm6, %v651_v40, %v2343_v51  ;;  %v298_v26 = vmul.f32 %v2470_v22, %v2171_v49 }
 0x1c7   : >> { %v2518_v37 = vadd.f32 %v655_v28, %v530_v17  ;;  %v2520_v42 = vadd.f32 %v656_v29, %v531_v38  ;;  %v2522_v46 = vadd.f32 %v657_v36, %v532_v32  ;;  %980 = vrot.lane.b32.xlu1 %v968_v43, %s1790_s0  ;;  %982 = vrot.lane.b32.xlu0 %v969_v54, %s1790_s0 }
 0x1c8   : >> { %v563_v51 = vadd.f32 %v555_v41, %v430_v34  ;;  %v970_v32 = vmul.f32 %v965_v23, %v2062_v11  ;;  %v556_v43 = vsel %vm454_vm5, %v2432_v53, %v2438_v58  ;;  %v431_v9 = vadd.f32 %v423_v47, %v298_v26 }
 0x1c9   : >> { %v2532_v17 = vpop.permute.xlu1 %679  ;;  %v682_v63 = vpop.permute.xlu0 %681  ;;  %v2546_v34 = vstv %s3140_s20  ;;  %v2563_v28 = vstv %s3141_s23  ;;  %v296_v47 = vmul.f32 %v2470_v22, %v2060_v10  ;;  %s3142_s20 = sld [smem:[#allocation32_spill]] }
 0x1ca   : >> { %v688_v54 = vsel %vm587_vm6, %v2532_v17, %v682_v63  ;;  %v564_v23 = vadd.f32 %v556_v43, %v431_v9  ;;  %v286_v5 = vmul.f32 %v2546_v34, %v2060_v10  ;;  %v281_v29 = vmul.f32 %v2563_v28, %v2060_v10  ;;  %s3143_s23 = sld [smem:[#allocation24_spill]] }
 0x1cb   : >> { %v2541_v7 = vadd.f32 %v688_v54, %v563_v51  ;;  %984 = vrot.lane.b32.xlu1 %v970_v32, %s1790_s0  ;;  %1010 = vrot.lane.b32.xlu0 %v1000_v4, %s1790_s0  ;;  %v1003_v51 = vmul.f32 %v999_v62, %v2175_v50  ;;  %v291_v9 = vmul.f32 %v2459_v13, %v2060_v10 }
 0x1cd   : >> { %v2548_v31 = vpop.permute.xlu1 %683  ;;  %v346_v53 = vpop.permute.xlu0 %345 }
 0x1ce   : >> { %v689_v21 = vsel %vm587_vm6, %v682_v63, %v2548_v31  ;;  %v355_v38 = vsel %vm321_vm4, %v346_v53, %v2358_v59  ;;  %v1004_v63 = vmul.f32 %v999_v62, %v2062_v11  ;;  %v936_v62 = vmul.f32 %v2447_v2, %v2175_v50 }
 0x1cf   : >> { %v2558_v40 = vadd.f32 %v689_v21, %v564_v23  ;;  %v363_v41 = vadd.f32 %v355_v38, %v286_v5  ;;  %1012 = vrot.lane.b32.xlu1 %v1001_v12, %s1790_s0  ;;  %1014 = vrot.lane.b32.xlu0 %v1002_v18, %s1790_s0  ;;  %v937_v53 = vmul.f32 %v2447_v2, %v2062_v11  ;;  %v1032_v18 = vstv %s3142_s20  ;;  %s3144_s20 = sld [smem:[#allocation28_spill]] }
 0x1d1   : >> { %v312_v36 = vpop.permute.xlu1 %311  ;;  %v412_v26 = vpop.permute.xlu0 %411 }
 0x1d2   : >> { %v322_v32 = vsel %vm321_vm4, %v312_v36, %v2341_v48  ;;  %v421_v4 = vsel %vm321_vm4, %v412_v26, %v2383_v8  ;;  %v1033_v36 = vmul.f32 %v1032_v18, %v2060_v10 }
 0x1d3   : >> { %v330_v43 = vadd.f32 %v322_v32, %v281_v29  ;;  %v429_v54 = vadd.f32 %v421_v4, %v296_v47  ;;  %1016 = vrot.lane.b32.xlu1 %v1003_v51, %s1790_s0  ;;  %1018 = vrot.lane.b32.xlu0 %v1004_v63, %s1790_s0  ;;  %v1034_v47 = vmul.f32 %v1032_v18, %v2163_v45 }
 0x1d4   : >> { %v1035_v32 = vmul.f32 %v1032_v18, %v2171_v49  ;;  %v1036_v4 = vmul.f32 %v1032_v18, %v2175_v50 }
 0x1d5   : >> { %v379_v23 = vpop.permute.xlu1 %378  ;;  %v479_v5 = vpop.permute.xlu0 %478 }
 0x1d6   : >> { %v388_v8 = vsel %vm321_vm4, %v379_v23, %v2369_v1  ;;  %v488_v12 = vsel %vm454_vm5, %v479_v5, %v2409_v24 }
 0x1d7   : >> { %v396_v21 = vadd.f32 %v388_v8, %v291_v9  ;;  %v496_v38 = vadd.f32 %v488_v12, %v363_v41  ;;  %949 = vrot.lane.b32.xlu1 %v936_v62, %s1789_s1  ;;  %951 = vrot.lane.b32.xlu0 %v937_v53, %s1789_s1  ;;  %v299_v62 = vmul.f32 %v2470_v22, %v2175_v50  ;;  %s1791_s1 = smov 121  }
 0x1d8   : >> { %v1037_v8 = vmul.f32 %v1032_v18, %v2062_v11  ;;  %v282_v22 = vmul.f32 %v2563_v28, %v2163_v45 }
 0x1d9   : >> { %v445_v13 = vpop.permute.xlu1 %444  ;;  %v545_v29 = vpop.permute.xlu0 %544 }
 0x1da   : >> { %v455_v2 = vsel %vm454_vm5, %v445_v13, %v2394_v16  ;;  %v554_v1 = vsel %vm454_vm5, %v545_v29, %v2430_v52 }
 0x1db   : >> { %v463_v26 = vadd.f32 %v455_v2, %v330_v43  ;;  %v562_v51 = vadd.f32 %v554_v1, %v429_v54  ;;  %1043 = vrot.lane.b32.xlu1 %v1033_v36, %s1790_s0  ;;  %1045 = vrot.lane.b32.xlu0 %v1034_v47, %s1790_s0  ;;  %v424_v43 = vsel %vm321_vm4, %v2392_v15, %v2308_v30  ;;  %v1098_v54 = vstv %s3143_s23  ;;  %s3151_s23 = sld [smem:[#allocation33_spill]] }
 0x1dc   : >> { %v1099_v12 = vmul.f32 %v1098_v54, %v2060_v10  ;;  %v432_v15 = vadd.f32 %v424_v43, %v299_v62  ;;  %v1100_v36 = vmul.f32 %v1098_v54, %v2163_v45  ;;  %v323_v47 = vsel %vm321_vm4, %v2341_v48, %v2350_v55 }
 0x1dd   : >> { %v512_v41 = vpop.permute.xlu1 %511  ;;  %v612_v63 = vpop.permute.xlu0 %611  ;;  %v324_v2 = vsel %vm321_vm4, %v2350_v55, %v2352_v56  ;;  %v284_v48 = vmul.f32 %v2563_v28, %v2175_v50  ;;  %v456_v55 = vsel %vm454_vm5, %v2394_v16, %v2400_v19  ;;  %v1103_v43 = vmul.f32 %v1098_v54, %v2062_v11 }
 0x1de   : >> { %v521_v9 = vsel %vm454_vm5, %v512_v41, %v2419_v33  ;;  %v621_v23 = vsel %vm587_vm6, %v612_v63, %v2461_v14  ;;  %v589_v16 = vsel %vm587_vm6, %v2440_v61, %v2449_v3 }
 0x1df   : >> { %v529_v52 = vadd.f32 %v521_v9, %v396_v21  ;;  %v2604_v5 = vadd.f32 %v621_v23, %v496_v38  ;;  %1047 = vrot.lane.b32.xlu1 %v1035_v32, %s1790_s0  ;;  %1049 = vrot.lane.b32.xlu0 %v1036_v4, %s1790_s0  ;;  %v557_v21 = vsel %vm454_vm5, %v2438_v58, %v2325_v39 }
 0x1e0   : >> { %v565_v18 = vadd.f32 %v557_v21, %v432_v15  ;;  %v331_v32 = vadd.f32 %v323_v47, %v282_v22  ;;  %v356_v15 = vsel %vm321_vm4, %v2358_v59, %v2360_v60  ;;  %v288_v59 = vmul.f32 %v2546_v34, %v2171_v49 }
 0x1e1   : >> { %v578_v53 = vpop.permute.xlu1 %577  ;;  %v678_v33 = vpop.permute.xlu0 %677 }
 0x1e2   : >> { %v588_v38 = vsel %vm587_vm6, %v578_v53, %v2440_v61  ;;  %v687_v30 = vsel %vm587_vm6, %v678_v33, %v2532_v17  ;;  %v1101_v17 = vmul.f32 %v1098_v54, %v2171_v49  ;;  %v464_v53 = vadd.f32 %v456_v55, %v331_v32  ;;  %v3147_v55 = vld [vmem:[#allocation44_spill] sm:$0xff] }
 0x1e3   : >> { %v596_v13 = vadd.f32 %v588_v38, %v463_v26  ;;  %v2623_v29 = vadd.f32 %v687_v30, %v562_v51  ;;  %1051 = vrot.lane.b32.xlu1 %v1037_v8, %s1790_s0  ;;  %1109 = vrot.lane.b32.xlu0 %v1099_v12, %s1791_s1  ;;  %v283_v51 = vmul.f32 %v2563_v28, %v2171_v49 }
 0x1e4   : >> { %v325_v28 = vsel %vm321_vm4, %v2352_v56, %v2301_v27  ;;  %v287_v27 = vmul.f32 %v2546_v34, %v2163_v45  ;;  %v458_v56 = vsel %vm454_vm5, %v2402_v20, %v2318_v35 }
 0x1e5   : >> { %v645_v39 = vpop.permute.xlu1 %644  ;;  %v686_v58 = vpop.permute.xlu0 %685  ;;  %v332_v4 = vadd.f32 %v324_v2, %v283_v51  ;;  %v3145_v51 = vld [vmem:[#allocation40_spill] sm:$0xff] }
 0x1e6   : >> { %v654_v1 = vsel %vm587_vm6, %v645_v39, %v2494_v57  ;;  %v690_v26 = vsel %vm587_vm6, %v2548_v31, %v686_v58  ;;  %v457_v57 = vsel %vm454_vm5, %v2400_v19, %v2402_v20  ;;  %v1132_v31 = vstv %s3144_s20  ;;  %s3155_s20 = sld [smem:[#allocation34_spill]] }
 0x1e7   : >> { %v2643_v41 = vadd.f32 %v654_v1, %v529_v52  ;;  %v2645_v63 = vadd.f32 %v690_v26, %v565_v18  ;;  %1111 = vrot.lane.b32.xlu1 %v1100_v36, %s1791_s1  ;;  %1113 = vrot.lane.b32.xlu0 %v1101_v17, %s1791_s1  ;;  %v1102_v52 = vmul.f32 %v1098_v54, %v2175_v50 }
 0x1e8   : >> { %v590_v19 = vsel %vm587_vm6, %v2449_v3, %v2451_v6  ;;  %v465_v33 = vadd.f32 %v457_v57, %v332_v4  ;;  %v1133_v61 = vmul.f32 %v1132_v31, %v2060_v10  ;;  %v333_v3 = vadd.f32 %v325_v28, %v284_v48  ;;  %v3146_v48 = vld [vmem:[#allocation43_spill] sm:$0xff] }
 0x1e9   : >> { %v711_v9 = vpop.permute.xlu1 %710  ;;  %v713_v23 = vpop.permute.xlu0 %712  ;;  %v597_v54 = vadd.f32 %v589_v16, %v464_v53  ;;  %v1134_v30 = vmul.f32 %v1132_v31, %v2163_v45  ;;  %v289_v58 = vmul.f32 %v2546_v34, %v2175_v50  ;;  %v364_v36 = vadd.f32 %v356_v15, %v287_v27  ;;  %v3149_v53 = vld [vmem:[#allocation45_spill] sm:$0xff]  ;;  %v3150_v27 = vld [vmem:[#allocation42_spill] sm:$0xff] }
 0x1ea   : >> { %v721_v62 = vsel %vm720_vm7, %v711_v9, %v713_v23  ;;  %v598_v12 = vadd.f32 %v590_v19, %v465_v33  ;;  %v466_v20 = vadd.f32 %v458_v56, %v333_v3  ;;  %v1135_v1 = vmul.f32 %v1132_v31, %v2171_v49 }
 0x1eb   : >> { %v2670_v8 = vadd.f32 %v721_v62, %v596_v13  ;;  %1115 = vrot.lane.b32.xlu1 %v1102_v52, %s1791_s1  ;;  %1117 = vrot.lane.b32.xlu0 %v1103_v43, %s1791_s1  ;;  %v591_v13 = vsel %vm587_vm6, %v2451_v6, %v2335_v44  ;;  %v357_v44 = vsel %vm321_vm4, %v2360_v60, %v2367_v0  ;;  %v1065_v52 = vstv %s2026_s18 }
 0x1ec   : >> { %v489_v6 = vsel %vm454_vm5, %v2409_v24, %v2411_v25  ;;  %v599_v17 = vadd.f32 %v591_v13, %v466_v20  ;;  %v1136_v26 = vmul.f32 %v1132_v31, %v2175_v50  ;;  %v358_v34 = vsel %vm321_vm4, %v2367_v0, %v3145_v51 }
 0x1ed   : >> { %v715_v21 = vpop.permute.xlu1 %714  ;;  %v717_v38 = vpop.permute.xlu0 %716  ;;  %v490_v60 = vsel %vm454_vm5, %v2411_v25, %v3146_v48  ;;  %v622_v24 = vsel %vm587_vm6, %v2461_v14, %v3147_v55  ;;  %v365_v32 = vadd.f32 %v357_v44, %v288_v59  ;;  %v497_v4 = vadd.f32 %v489_v6, %v364_v36 }
 0x1ee   : >> { %v722_v22 = vsel %vm720_vm7, %v713_v23, %v715_v21  ;;  %v723_v35 = vsel %vm720_vm7, %v715_v21, %v717_v38  ;;  %v3148_v23 = vld [vmem:[#allocation41_spill] sm:$0xff]  ;;  %v1137_v25 = vmul.f32 %v1132_v31, %v2062_v11  ;;  %v366_v43 = vadd.f32 %v358_v34, %v289_v58 }
 0x1ef   : >> { %v2689_v18 = vadd.f32 %v722_v22, %v597_v54  ;;  %v2691_v39 = vadd.f32 %v723_v35, %v598_v12  ;;  %1143 = vrot.lane.b32.xlu1 %v1133_v61, %s1791_s1  ;;  %1145 = vrot.lane.b32.xlu0 %v1134_v30, %s1791_s1  ;;  %v491_v0 = vsel %vm454_vm5, %v3146_v48, %v3148_v23 }
 0x1f0   : >> { %v498_v28 = vadd.f32 %v490_v60, %v365_v32  ;;  %v630_v14 = vadd.f32 %v622_v24, %v497_v4  ;;  %v1066_v62 = vmul.f32 %v1065_v52, %v2060_v10  ;;  %v623_v33 = vsel %vm587_vm6, %v3147_v55, %v3149_v53 }
 0x1f1   : >> { %v719_v47 = vpop.permute.xlu1 %718  ;;  %v745_v2 = vpop.permute.xlu0 %744  ;;  %v624_v56 = vsel %vm587_vm6, %v3149_v53, %v3150_v27  ;;  %v499_v3 = vadd.f32 %v491_v0, %v366_v43  ;;  %v1067_v13 = vmul.f32 %v1065_v52, %v2163_v45  ;;  %v1068_v22 = vmul.f32 %v1065_v52, %v2171_v49 }
 0x1f2   : >> { %v724_v57 = vsel %vm720_vm7, %v717_v38, %v719_v47  ;;  %v631_v21 = vadd.f32 %v623_v33, %v498_v28  ;;  %v1069_v6 = vmul.f32 %v1065_v52, %v2175_v50  ;;  %v1070_v36 = vmul.f32 %v1065_v52, %v2062_v11 }
 0x1f3   : >> { %v2717_v9 = vadd.f32 %v724_v57, %v599_v17  ;;  %1147 = vrot.lane.b32.xlu1 %v1135_v1, %s1791_s1  ;;  %1149 = vrot.lane.b32.xlu0 %v1136_v26, %s1791_s1  ;;  %v632_v38 = vadd.f32 %v624_v56, %v499_v3  ;;  %v1165_v47 = vstv %s3151_s23  ;;  %s3156_s23 = sld [smem:[#allocation38_spill]] }
 0x1f4   : >> { %v1166_v51 = vmul.f32 %v1165_v47, %v2060_v10  ;;  %v1167_v34 = vmul.f32 %v1165_v47, %v2163_v45  ;;  %v1168_v32 = vmul.f32 %v1165_v47, %v2171_v49  ;;  %v1169_v4 = vmul.f32 %v1165_v47, %v2175_v50 }
 0x1f5   : >> { %v747_v16 = vpop.permute.xlu1 %746  ;;  %v749_v19 = vpop.permute.xlu0 %748  ;;  %v1170_v52 = vmul.f32 %v1165_v47, %v2062_v11 }
 0x1f6   : >> { %v754_v61 = vsel %vm720_vm7, %v745_v2, %v747_v16  ;;  %v755_v31 = vsel %vm720_vm7, %v747_v16, %v749_v19 }
 0x1f7   : >> { %v2736_v54 = vadd.f32 %v754_v61, %v2604_v5  ;;  %v2738_v12 = vadd.f32 %v755_v31, %v630_v14  ;;  %1151 = vrot.lane.b32.xlu1 %v1137_v25, %s1791_s1  ;;  %1076 = vrot.lane.b32.xlu0 %v1066_v62, %s1790_s0 }
 0x1f9   : >> { %v751_v30 = vpop.permute.xlu1 %750  ;;  %v753_v15 = vpop.permute.xlu0 %752 }
 0x1fa   : >> { %v756_v35 = vsel %vm720_vm7, %v749_v19, %v751_v30  ;;  %v757_v5 = vsel %vm720_vm7, %v751_v30, %v753_v15 }
 0x1fb   : >> { %v2746_v20 = vadd.f32 %v756_v35, %v631_v21  ;;  %v2748_v59 = vadd.f32 %v757_v5, %v632_v38  ;;  %1078 = vrot.lane.b32.xlu1 %v1067_v13, %s1790_s0  ;;  %1080 = vrot.lane.b32.xlu0 %v1068_v22, %s1790_s0 }
 0x1fd   : >> { %v778_v58 = vpop.permute.xlu1 %777  ;;  %v780_v44 = vpop.permute.xlu0 %779 }
 0x1fe   : >> { %v787_v17 = vsel %vm720_vm7, %v778_v58, %v780_v44 }
 0x1ff   : >> { %v2757_v2 = vadd.f32 %v787_v17, %v2643_v41  ;;  %1082 = vrot.lane.b32.xlu1 %v1069_v6, %s1790_s0  ;;  %1084 = vrot.lane.b32.xlu0 %v1070_v36, %s1790_s0  ;;  %s3152_s0 = sld [smem:[#allocation25_spill]] }
 0x201   : >> { %v782_v1 = vpop.permute.xlu1 %781  ;;  %v784_v26 = vpop.permute.xlu0 %783 }
 0x202   : >> { %v788_v48 = vsel %vm720_vm7, %v780_v44, %v782_v1  ;;  %v789_v60 = vsel %vm720_vm7, %v782_v1, %v784_v26 }
 0x203   : >> { %v2766_v55 = vadd.f32 %v788_v48, %v2518_v37  ;;  %v2769_v41 = vadd.f32 %v789_v60, %v2520_v42  ;;  %1176 = vrot.lane.b32.xlu1 %v1166_v51, %s1791_s1  ;;  %1178 = vrot.lane.b32.xlu0 %v1167_v34, %s1791_s1  ;;  %v1198_v37 = vstv %s2028_s21 }
 0x204   : >> { %v1199_v43 = vmul.f32 %v1198_v37, %v2060_v10  ;;  %v1200_v53 = vmul.f32 %v1198_v37, %v2163_v45  ;;  %v1201_v10 = vmul.f32 %v1198_v37, %v2171_v49  ;;  %v1202_v45 = vmul.f32 %v1198_v37, %v2175_v50 }
 0x205   : >> { %v786_v24 = vpop.permute.xlu1 %785  ;;  %v811_v57 = vpop.permute.xlu0 %810  ;;  %v1203_v49 = vmul.f32 %v1198_v37, %v2062_v11 }
 0x206   : >> { %v790_v23 = vsel %vm720_vm7, %v784_v26, %v786_v24 }
 0x207   : >> { %v2777_v0 = vadd.f32 %v790_v23, %v2522_v46  ;;  %1180 = vrot.lane.b32.xlu1 %v1168_v32, %s1791_s1  ;;  %1182 = vrot.lane.b32.xlu0 %v1169_v4, %s1791_s1 }
 0x209   : >> { %v813_v42 = vpop.permute.xlu1 %812  ;;  %v815_v25 = vpop.permute.xlu0 %814 }
 0x20a   : >> { %v820_v28 = vsel %vm720_vm7, %v811_v57, %v813_v42  ;;  %v821_v14 = vsel %vm720_vm7, %v813_v42, %v815_v25 }
 0x20b   : >> { %v2787_v16 = vadd.f32 %v820_v28, %v2623_v29  ;;  %v2790_v46 = vadd.f32 %v821_v14, %v2541_v7  ;;  %1184 = vrot.lane.b32.xlu1 %v1170_v52, %s1791_s1  ;;  %1209 = vrot.lane.b32.xlu0 %v1199_v43, %s1791_s1 }
 0x20d   : >> { %v817_v19 = vpop.permute.xlu1 %816  ;;  %v819_v62 = vpop.permute.xlu0 %818 }
 0x20e   : >> { %v822_v33 = vsel %vm720_vm7, %v815_v25, %v817_v19  ;;  %v823_v27 = vsel %vm720_vm7, %v817_v19, %v819_v62 }
 0x20f   : >> { %v2799_v29 = vadd.f32 %v822_v33, %v2558_v40  ;;  %v2802_v7 = vadd.f32 %v823_v27, %v2645_v63  ;;  %1211 = vrot.lane.b32.xlu1 %v1200_v53, %s1791_s1  ;;  %1213 = vrot.lane.b32.xlu0 %v1201_v10, %s1791_s1 }
 0x211   : >> { %v844_v56 = vpop.permute.xlu1 %843  ;;  %v846_v61 = vpop.permute.xlu0 %845 }
 0x212   : >> { %v854_v31 = vsel %vm853_vm8, %v844_v56, %v846_v61 }
 0x213   : >> { %v862_v3 = vadd.f32 %v854_v31, %v2670_v8  ;;  %1215 = vrot.lane.b32.xlu1 %v1202_v45, %s1791_s1  ;;  %1217 = vrot.lane.b32.xlu0 %v1203_v49, %s1791_s1  ;;  %s3153_s1 = sld [smem:[#allocation29_spill]] }
 0x215   : >> { %v848_v40 = vpop.permute.xlu1 %847  ;;  %v850_v63 = vpop.permute.xlu0 %849 }
 0x216   : >> { %v855_v21 = vsel %vm853_vm8, %v846_v61, %v848_v40  ;;  %v856_v38 = vsel %vm853_vm8, %v848_v40, %v850_v63 }
 0x217   : >> { %v863_v30 = vadd.f32 %v855_v21, %v2689_v18  ;;  %v864_v50 = vadd.f32 %v856_v38, %v2691_v39 }
 0x219   : >> { %v852_v15 = vpop.permute.xlu1 %851  ;;  %v878_v11 = vpop.permute.xlu0 %877 }
 0x21a   : >> { %v857_v13 = vsel %vm853_vm8, %v850_v63, %v852_v15 }
 0x21b   : >> { %v865_v8 = vadd.f32 %v857_v13, %v2717_v9 }
 0x21d   : >> { %v880_v22 = vpop.permute.xlu1 %879  ;;  %v882_v35 = vpop.permute.xlu0 %881 }
 0x21e   : >> { %v887_v5 = vsel %vm853_vm8, %v878_v11, %v880_v22  ;;  %v888_v58 = vsel %vm853_vm8, %v880_v22, %v882_v35  ;;  %v1231_v22 = vstv %s3152_s0  ;;  %s3157_s0 = sshll.u32 %s1777_s14, 5  ;;  %s243_s14 = sadd.s32 1, %s1777_s14  }
 0x21f   : >> { %v2821_v44 = vadd.f32 %v887_v5, %v2736_v54  ;;  %v2824_v6 = vadd.f32 %v888_v58, %v2738_v12  ;;  %v2884_v5 = vld [vmem:[%s2053_s2] sm:$0xff]  ;;  %p240_p8 = scmp.ge.s32.totalorder %s243_s14, 16  }
 0x220   : >> { %v1232_v58 = vmul.f32 %v2884_v5, %v1231_v22  ;;  %s3160_s14 = sld [smem:[#allocation48_spill]] (%p240_p8)  ;;  %s1339_s5 = sshll.u32 (%p240_p8), %s2042_s25, 4  ;;  %s3004_s5 = int_to_ptr.vmem [resolvable:$true] %s1339_s5 }
 0x221   : >> { %v884_v18 = vpop.permute.xlu1 %883  ;;  %v886_v39 = vpop.permute.xlu0 %885  ;;  %s1324_s6 = scalar_lea.sflag (%p240_p8), [#allocation5], %s1948_s7 }
 0x222   : >> { %v889_v36 = vsel %vm853_vm8, %v882_v35, %v884_v18  ;;  %v890_v17 = vsel %vm853_vm8, %v884_v18, %v886_v39 }
 0x223   : >> { %v2829_v9 = vadd.f32 %v889_v36, %v2746_v20  ;;  %v2832_v47 = vadd.f32 %v890_v17, %v2748_v59  ;;  %v1240_v36 = vstv %s3153_s1  ;;  %s1316_s1 = scalar_lea.vmem %s2042_s25, %s3157_s0 [#allocation8] }
 0x225   : >> { %v911_v1 = vpop.permute.xlu1 %910  ;;  %v913_v26 = vpop.permute.xlu0 %912 }
 0x226   : >> { %v920_v54 = vsel %vm853_vm8, %v911_v1, %v913_v26  ;;  %s3161_s3 = smov (%p240_p8), %s3160_s14 }
 0x227   : >> { %v2836_v51 = vadd.f32 %v920_v54, %v2757_v2 }
 0x229   : >> { %v915_v12 = vpop.permute.xlu1 %914  ;;  %v917_v34 = vpop.permute.xlu0 %916 }
 0x22a   : >> { %v921_v48 = vsel %vm853_vm8, %v913_v26, %v915_v12  ;;  %v922_v60 = vsel %vm853_vm8, %v915_v12, %v917_v34  ;;  %v2893_v12 = vld [vmem:[%s2053_s2 + $0x8] sm:$0xff] }
 0x22b   : >> { %v2841_v24 = vadd.f32 %v921_v48, %v2766_v55  ;;  %v2844_v20 = vadd.f32 %v922_v60, %v2769_v41  ;;  %v1241_v48 = vmul.f32 %v2884_v5, %v1240_v36 }
 0x22d   : >> { %v919_v59 = vpop.permute.xlu1 %918  ;;  %v944_v57 = vpop.permute.xlu0 %943 }
 0x22e   : >> { %v923_v32 = vsel %vm853_vm8, %v917_v34, %v919_v59  ;;  %v1233_v34 = vmul.f32 %v2893_v12, %v1231_v22 }
 0x22f   : >> { %v2848_v4 = vadd.f32 %v923_v32, %v2777_v0 }
 0x231   : >> { %v946_v2 = vpop.permute.xlu1 %945  ;;  %v948_v23 = vpop.permute.xlu0 %947 }
 0x232   : >> { %v953_v37 = vsel %vm853_vm8, %v944_v57, %v946_v2  ;;  %v954_v42 = vsel %vm853_vm8, %v946_v2, %v948_v23 }
 0x233   : >> { %v2853_v25 = vadd.f32 %v953_v37, %v2787_v16  ;;  %v2856_v55 = vadd.f32 %v954_v42, %v2790_v46  ;;  %v2900_v37 = vld [vmem:[%s2053_s2 + $0x10] sm:$0xff] }
 0x234   : >> { %v1234_v42 = vmul.f32 %v2900_v37, %v1231_v22 }
 0x235   : >> { %v977_v41 = vpop.permute.xlu1 %976  ;;  %v979_v52 = vpop.permute.xlu0 %978 }
 0x236   : >> { %v987_v43 = vsel %vm986_vm9, %v977_v41, %v979_v52 }
 0x237   : >> { %v995_v28 = vadd.f32 %v987_v43, %v862_v3 }
 0x239   : >> { %v981_v0 = vpop.permute.xlu1 %980  ;;  %v983_v14 = vpop.permute.xlu0 %982 }
 0x23a   : >> { %v988_v19 = vsel %vm986_vm9, %v979_v52, %v981_v0  ;;  %v989_v62 = vsel %vm986_vm9, %v981_v0, %v983_v14 }
 0x23b   : >> { %v996_v53 = vadd.f32 %v988_v19, %v863_v30  ;;  %v997_v10 = vadd.f32 %v989_v62, %v864_v50 }
 0x23d   : >> { %v985_v33 = vpop.permute.xlu1 %984  ;;  %v1011_v16 = vpop.permute.xlu0 %1010 }
 0x23e   : >> { %v990_v27 = vsel %vm986_vm9, %v983_v14, %v985_v33  ;;  %v1242_v14 = vmul.f32 %v2893_v12, %v1240_v36  ;;  %v1243_v33 = vmul.f32 %v2900_v37, %v1240_v36 }
 0x23f   : >> { %v998_v46 = vadd.f32 %v990_v27, %v865_v8 }
 0x241   : >> { %v1013_v56 = vpop.permute.xlu1 %1012  ;;  %v1015_v61 = vpop.permute.xlu0 %1014 }
 0x242   : >> { %v1020_v17 = vsel %vm986_vm9, %v1011_v16, %v1013_v56  ;;  %v1021_v54 = vsel %vm986_vm9, %v1013_v56, %v1015_v61 }
 0x243   : >> { %v1028_v60 = vadd.f32 %v1020_v17, %v2821_v44  ;;  %v1029_v19 = vadd.f32 %v1021_v54, %v2824_v6 }
 0x245   : >> { %v1017_v45 = vpop.permute.xlu1 %1016  ;;  %v1019_v49 = vpop.permute.xlu0 %1018 }
 0x246   : >> { %v1022_v59 = vsel %vm986_vm9, %v1015_v61, %v1017_v45 }
 0x247   : >> { %v1030_v62 = vadd.f32 %v1022_v59, %v2829_v9 }
 0x249   : >> { %v2862_v31 = vpop.permute.xlu1 %949  ;;  %v2864_v3 = vpop.permute.xlu0 %951 }
 0x24a   : >> { %v955_v40 = vsel %vm853_vm8, %v948_v23, %v2862_v31 }
 0x24b   : >> { %v2869_v63 = vadd.f32 %v955_v40, %v2799_v29 }
 0x24d   : >> { %v2871_v21 = vpop.permute.xlu1 %1043  ;;  %v2873_v38 = vpop.permute.xlu0 %1045 }
 0x251   : >> { %v2875_v30 = vpop.permute.xlu1 %1047  ;;  %v2877_v50 = vpop.permute.xlu0 %1049 }
 0x255   : >> { %v2879_v15 = vpop.permute.xlu1 %1051  ;;  %v1110_v11 = vpop.permute.xlu0 %1109 }
 0x259   : >> { %v1112_v13 = vpop.permute.xlu1 %1111  ;;  %v1114_v8 = vpop.permute.xlu0 %1113 }
 0x25a   : >> { %v1120_v29 = vsel %vm1119_vm10, %v1110_v11, %v1112_v13  ;;  %v1121_v1 = vsel %vm1119_vm10, %v1112_v13, %v1114_v8 }
 0x25b   : >> { %v1128_v35 = vadd.f32 %v1120_v29, %v995_v28  ;;  %v1129_v32 = vadd.f32 %v1121_v1, %v996_v53  ;;  %v2906_v28 = vld [vmem:[%s2053_s2 + $0x18] sm:$0xff]  ;;  %v1023_v53 = vsel %vm986_vm9, %v1017_v45, %v1019_v49  ;;  %s3154_s2 = sld [smem:[#allocation39_spill]]  ;;  %v1271_v1 = vstv %s2032_s9  ;;  %s1792_s9 = smov (%p240_p8), [#allocation8]  }
 0x25c   : >> { %v1235_v0 = vmul.f32 %v2906_v28, %v1231_v22  ;;  %v1031_v9 = vadd.f32 %v1023_v53, %v2832_v47  ;;  %v1244_v45 = vmul.f32 %v2906_v28, %v1240_v36  ;;  %s1687_s10 = sshll.u32 (%p240_p8), %s1792_s9, 4  ;;  %s1688_s10 = int_to_ptr.vmem [resolvable:$false] %s1687_s10 }
 0x25d   : >> { %v1116_v18 = vpop.permute.xlu1 %1115  ;;  %v1118_v39 = vpop.permute.xlu0 %1117  ;;  %v1236_v57 = vadd.f32 %v1232_v58, %v1128_v35  ;;  %s1689_s11 = scalar_lea.vmem (%p240_p8), %s1688_s10, 16384  ;;  %p1690_p1 = scmp.lt.s32.totalorder (%p240_p8), %s3004_s5, %s1688_s10 }
 0x25e   : >> { %v1122_v26 = vsel %vm1119_vm10, %v1114_v8, %v1116_v18  ;;  %v1123_v52 = vsel %vm1119_vm10, %v1116_v18, %v1118_v39 }
 0x25f   : >> { %v1130_v41 = vadd.f32 %v1122_v26, %v997_v10  ;;  %1604 = vtanh.f32 %v1236_v57  ;;  %v1237_v10 = vadd.f32 %v1233_v34, %v1129_v32  ;;  %v1131_v16 = vadd.f32 %v1123_v52, %v998_v46 }
 0x260   : >> { %v1249_v32 = vstv %s3155_s20  ;;  %s3159_s20 = sld [smem:[#allocation18_spill]] (%p240_p8) }
 0x261   : >> { %v1144_v2 = vpop.permute.xlu1 %1143  ;;  %v1146_v23 = vpop.permute.xlu0 %1145  ;;  %v1238_v40 = vadd.f32 %v1234_v42, %v1130_v41  ;;  %v1239_v49 = vadd.f32 %v1235_v0, %v1131_v16  ;;  %v1280_v26 = vstv %s3154_s2  ;;  %s3158_s2 = sld [smem:[#allocation15_spill]] (%p240_p8) }
 0x262   : >> { %v1153_v43 = vsel %vm1119_vm10, %v1144_v2, %v1146_v23 }
 0x263   : >> { %v1161_v44 = vadd.f32 %v1153_v43, %v1028_v60  ;;  %v1053_v60 = vsel %vm986_vm9, %v2871_v21, %v2873_v38  ;;  %v1054_v43 = vsel %vm986_vm9, %v2873_v38, %v2875_v30  ;;  %v1055_v21 = vsel %vm986_vm9, %v2875_v30, %v2877_v50 }
 0x264   : >> { %v1061_v52 = vadd.f32 %v1053_v60, %v2836_v51  ;;  %v1056_v30 = vsel %vm986_vm9, %v2877_v50, %v2879_v15  ;;  %v1258_v60 = vstv %s3156_s23 }
 0x265   : >> { %v1245_v27 = vadd.f32 %v1241_v48, %v1161_v44  ;;  %v1148_v56 = vpop.permute.xlu1 %1147  ;;  %v1150_v61 = vpop.permute.xlu0 %1149  ;;  %v1064_v50 = vadd.f32 %v1056_v30, %v2848_v4  ;;  %v1293_v4 = vstv %s2036_s8  ;;  %s1683_s8 = scalar_lea.vmem (%p240_p8), %s3004_s5, 8192 }
 0x266   : >> { %v1154_v11 = vsel %vm1119_vm10, %v1146_v23, %v1148_v56  ;;  %v1155_v13 = vsel %vm1119_vm10, %v1148_v56, %v1150_v61  ;;  %v1062_v56 = vadd.f32 %v1054_v43, %v2841_v24  ;;  %p1684_p13 = scmp.ne.s32.totalorder (%p240_p8), %s3004_s5, %s1683_s8  ;;  %p3162_p0 = scmp.ne.s32.totalorder (%p240_p8), %s3159_s20, 0 }
 0x267   : >> { %1606 = vtanh.f32 %v1245_v27  ;;  %v1162_v8 = vadd.f32 %v1154_v11, %v1029_v19  ;;  %v1163_v6 = vadd.f32 %v1155_v13, %v1030_v62  ;;  %v1063_v13 = vadd.f32 %v1055_v21, %v2844_v20  ;;  %s1509_s23 = sshll.u32 (%p240_p8), %s3158_s2, 13  ;;  %p1691_p7 = scmp.lt.s32.totalorder (%p240_p8), %s1689_s11, %s1683_s8 }
 0x268   : >> { %1608 = vtanh.f32 %v1237_v10  ;;  %s3001_s4 = scalar_lea.hbm (%p240_p8), %s3160_s14, %s1509_s23  ;;  %p1685_p2 = pnand (%p240_p8), %p1684_p13, %p3162_p0 }
 0x269   : >> { %v1246_v46 = vadd.f32 %v1242_v14, %v1162_v8  ;;  %v1247_v22 = vadd.f32 %v1243_v33, %v1163_v6  ;;  %v1152_v29 = vpop.permute.xlu1 %1151  ;;  %v2918_v35 = vpop.permute.xlu0 %1076  ;;  %1610 = vtanh.f32 %v1238_v40  ;;  %v1250_v14 = vmul.f32 %v2884_v5, %v1249_v32  ;;  %p1692_p12 = por (%p240_p8), %p1691_p7, %p1690_p1 }
 0x26a   : >> { %v1156_v58 = vsel %vm1119_vm10, %v1150_v61, %v1152_v29  ;;  %v1605_v17 = vpop.eup %1604  ;;  %v1251_v61 = vmul.f32 %v2893_v12, %v1249_v32  ;;  %v1252_v40 = vmul.f32 %v2900_v37, %v1249_v32  ;;  %p1686_p6 = pneg (%p240_p8), %p1685_p2 }
 0x26b   : >> { %1612 = vtanh.f32 %v1246_v46  ;;  %v1164_v18 = vadd.f32 %v1156_v58, %v1031_v9  ;;  %v1272_v59 = vmul.f32 %v1605_v17, %v1271_v1 }
 0x26c   : >> { %1614 = vtanh.f32 %v1247_v22  ;;  %p1693_p4 = pnand (%p240_p8), %p1692_p12, %p1686_p6 }
 0x26d   : >> { %1616 = vtanh.f32 %v1239_v49  ;;  %v1248_v47 = vadd.f32 %v1244_v45, %v1164_v18  ;;  %v1079_v39 = vpop.permute.xlu1 %1078  ;;  %v2921_v36 = vpop.permute.xlu0 %1080  ;;  %v1253_v18 = vmul.f32 %v2906_v28, %v1249_v32  ;;  %v956_v32 = vsel %vm853_vm8, %v2862_v31, %v2864_v3 }
 0x26f   : >> { %1618 = vtanh.f32 %v1248_v47 }
 0x271   : >> { %v1607_v54 = vpop.eup %1606  ;;  %v2925_v34 = vpop.permute.xlu1 %1082 }
 0x272   : >> { %v2927_v48 = vpop.permute.xlu0 %1084  ;;  %v1281_v57 = vmul.f32 %v1607_v54, %v1280_v26  ;;  %v1609_v2 = vpop.eup %1608 }
 0x273   : >> { %v1611_v23 = vpop.eup %1610  ;;  %v1273_v62 = vmul.f32 %v1609_v2, %v1271_v1  ;;  %v1259_v2 = vmul.f32 %v2884_v5, %v1258_v60  ;;  %v1089_v31 = vsel %vm986_vm9, %v2925_v34, %v2927_v48 }
 0x274   : >> { %v2933_v42 = vadd.f32 %v1281_v57, %v1272_v59  ;;  %v1274_v16 = vmul.f32 %v1611_v23, %v1271_v1 }
 0x275   : >> { %v1613_v41 = vpop.eup %1612  ;;  %v1177_v0 = vpop.permute.xlu1 %1176 }
 0x276   : >> { %v1179_v44 = vpop.permute.xlu0 %1178  ;;  %v1615_v19 = vpop.eup %1614  ;;  %v1282_v53 = vmul.f32 %v1613_v41, %v1280_v26 }
 0x277   : >> { %v1186_v33 = vsel %vm1119_vm10, %v1177_v0, %v1179_v44  ;;  %v1617_v10 = vpop.eup %1616  ;;  %v1283_v51 = vmul.f32 %v1615_v19, %v1280_v26  ;;  %v1088_v0 = vsel %vm986_vm9, %v2921_v36, %v2925_v34 }
 0x278   : >> { %v1194_v27 = vadd.f32 %v1186_v33, %v1061_v52  ;;  %v2945_v38 = vadd.f32 %v1282_v53, %v1273_v62  ;;  %v1275_v24 = vmul.f32 %v1617_v10, %v1271_v1  ;;  %v1086_v1 = vsel %vm986_vm9, %v2918_v35, %v1079_v39 }
 0x279   : >> { %v1619_v11 = vpop.eup %1618  ;;  %v2953_v8 = vadd.f32 %v1283_v51, %v1274_v16  ;;  %v1181_v9 = vpop.permute.xlu1 %1180  ;;  %v1094_v23 = vadd.f32 %v1086_v1, %v2853_v25  ;;  %v964_v25 = vadd.f32 %v956_v32, %v2802_v7 }
 0x27a   : >> { %v1254_v6 = vadd.f32 %v1250_v14, %v1194_v27  ;;  %v1183_v45 = vpop.permute.xlu0 %1182  ;;  %v1284_v49 = vmul.f32 %v1619_v11, %v1280_v26  ;;  %v1187_v46 = vsel %vm1119_vm10, %v1179_v44, %v1181_v9  ;;  %v1087_v26 = vsel %vm986_vm9, %v1079_v39, %v2921_v36 }
 0x27b   : >> { %v1188_v22 = vsel %vm1119_vm10, %v1181_v9, %v1183_v45  ;;  %v1195_v29 = vadd.f32 %v1187_v46, %v1062_v56  ;;  %v1095_v41 = vadd.f32 %v1087_v26, %v2856_v55  ;;  %v1260_v39 = vmul.f32 %v2893_v12, %v1258_v60 }
 0x27c   : >> { %1620 = vtanh.f32 %v1254_v6  ;;  %v1196_v20 = vadd.f32 %v1188_v22, %v1063_v13  ;;  %v1288_v58 = vadd.f32 %v1284_v49, %v1275_v24  ;;  %v1261_v12 = vmul.f32 %v2900_v37, %v1258_v60 }
 0x27d   : >> { %v1255_v15 = vadd.f32 %v1251_v61, %v1195_v29  ;;  %v1185_v17 = vpop.permute.xlu1 %1184  ;;  %v1262_v14 = vmul.f32 %v2906_v28, %v1258_v60  ;;  %v1096_v36 = vadd.f32 %v1088_v0, %v2869_v63  ;;  %v1097_v21 = vadd.f32 %v1089_v31, %v964_v25 }
 0x27e   : >> { %v1256_v47 = vadd.f32 %v1252_v40, %v1196_v20  ;;  %v1210_v54 = vpop.permute.xlu0 %1209  ;;  %v1189_v59 = vsel %vm1119_vm10, %v1183_v45, %v1185_v17  ;;  %v1306_v9 = vstv %s2038_s16 }
 0x27f   : >> { %1622 = vtanh.f32 %v1255_v15  ;;  %v1197_v57 = vadd.f32 %v1189_v59, %v1064_v50 }
 0x280   : >> { %1624 = vtanh.f32 %v1256_v47 }
 0x281   : >> { %v1257_v35 = vadd.f32 %v1253_v18, %v1197_v57  ;;  %v1212_v52 = vpop.permute.xlu1 %1211 }
 0x282   : >> { %v1214_v43 = vpop.permute.xlu0 %1213  ;;  %v1219_v3 = vsel %vm1119_vm10, %v1210_v54, %v1212_v52 }
 0x283   : >> { %v1220_v5 = vsel %vm1119_vm10, %v1212_v52, %v1214_v43  ;;  %1626 = vtanh.f32 %v1257_v35  ;;  %v1227_v55 = vadd.f32 %v1219_v3, %v1094_v23 }
 0x284   : >> { %v1228_v44 = vadd.f32 %v1220_v5, %v1095_v41 }
 0x285   : >> { %v1263_v62 = vadd.f32 %v1259_v2, %v1227_v55  ;;  %v1216_v34 = vpop.permute.xlu1 %1215 }
 0x286   : >> { %v1621_v19 = vpop.eup %1620  ;;  %v1264_v53 = vadd.f32 %v1260_v39, %v1228_v44  ;;  %v1218_v48 = vpop.permute.xlu0 %1217  ;;  %v1221_v10 = vsel %vm1119_vm10, %v1214_v43, %v1216_v34 }
 0x287   : >> { %v1294_v33 = vmul.f32 %v1621_v19, %v1293_v4  ;;  %v1222_v7 = vsel %vm1119_vm10, %v1216_v34, %v1218_v48  ;;  %1628 = vtanh.f32 %v1263_v62  ;;  %v1229_v16 = vadd.f32 %v1221_v10, %v1096_v36 }
 0x288   : >> { %v1230_v51 = vadd.f32 %v1222_v7, %v1097_v21  ;;  %1630 = vtanh.f32 %v1264_v53 }
 0x289   : >> { %v1298_v37 = vadd.f32 %v1294_v33, %v2933_v42  ;;  %v1623_v28 = vpop.eup %1622  ;;  %v1265_v27 = vadd.f32 %v1261_v12, %v1229_v16 }
 0x28a   : >> { %v1266_v63 = vadd.f32 %v1262_v14, %v1230_v51  ;;  %v1625_v56 = vpop.eup %1624  ;;  %v1295_v61 = vmul.f32 %v1623_v28, %v1293_v4 }
 0x28b   : >> { %v1296_v40 = vmul.f32 %v1625_v56, %v1293_v4  ;;  %1632 = vtanh.f32 %v1265_v27 }
 0x28c   : >> { %v1299_v11 = vadd.f32 %v1295_v61, %v2945_v38  ;;  %1634 = vtanh.f32 %v1266_v63 }
 0x28d   : >> { %v1627_v13 = vpop.eup %1626  ;;  %v1300_v30 = vadd.f32 %v1296_v40, %v2953_v8 }
 0x28e   : >> { %v1297_v6 = vmul.f32 %v1627_v13, %v1293_v4 }
 0x290   : >> { %v1301_v45 = vadd.f32 %v1297_v6, %v1288_v58 }
 0x291   : >> { %v1629_v42 = vpop.eup %1628 }
 0x292   : >> { %v1631_v24 = vpop.eup %1630  ;;  %v1307_v49 = vmul.f32 %v1629_v42, %v1306_v9 }
 0x293   : >> { %v1308_v46 = vmul.f32 %v1631_v24, %v1306_v9 }
 0x294   : >> { %v1311_v22 = vadd.f32 %v1307_v49, %v1298_v37 }
 0x295   : >> { %v1633_v29 = vpop.eup %1632  ;;  %v1312_v20 = vadd.f32 %v1308_v46, %v1299_v11  ;;  %242 = sbr.rel (!%p240_p8) target bundleno = 127 (0x7f), region = 91 }
 0x296   : >> { %v1635_v18 = vpop.eup %1634  ;;  %1317 = vst [vmem:[%s1316_s1] sm:$0xff] %v1311_v22  ;;  %v1309_v50 = vmul.f32 %v1633_v29, %v1306_v9 }
 0x297   : >> { %1318 = vst [vmem:[%s1316_s1 + $0x8] sm:$0xff] %v1312_v20  ;;  %v1310_v38 = vmul.f32 %v1635_v18, %v1306_v9 }
 0x298   : >> { %v1313_v15 = vadd.f32 %v1309_v50, %v1300_v30 }
 0x299   : >> { %v1314_v47 = vadd.f32 %v1310_v38, %v1301_v45 }
 0x29a   : >> { %1319 = vst [vmem:[%s1316_s1 + $0x10] sm:$0xff] %v1313_v15 }
 0x29b   : >> { %1320 = vst [vmem:[%s1316_s1 + $0x18] sm:$0xff] %v1314_v47 }
 0x29c   : > { %1696 = shalt.err (!%p1693_p4)
}
 0x29d   : > { %s1697_s12 = scalar_lea.hbm %s3001_s4, 8192  ;;  %s1701_s25 = scalar_lea.hbm %s3161_s3, 16384 }
 0x29e   : > { %p1698_p10 = scmp.ne.s32.totalorder %s3001_s4, %s1697_s12  ;;  %p1702_p9 = scmp.lt.u32.totalorder %s3001_s4, %s3161_s3 }
 0x29f   : > { %p1703_p3 = scmp.lt.u32.totalorder %s1701_s25, %s1697_s12  ;;  %p1705_p13 = scmp.lt.u32.totalorder %s1697_s12, %s3001_s4 }
 0x2a0   : > { %p1699_p11 = pnand %p1698_p10, %p3162_p0 }
 0x2a1   : > { %p1704_p8 = por %p1703_p3, %p1702_p9 }
 0x2a2   : > { %p1700_p5 = pneg %p1699_p11 }
 0x2a3   : > { %p1706_p2 = por %p1705_p13, %p1704_p8 }
 0x2a5   : > { %p1707_p6 = pnand %p1706_p2, %p1700_p5 }
 0x2a7   : > { %1710 = shalt.err (!%p1707_p6)
}
 0x2a8   : > { %s1793_s22 = smov 512   ;;  %s1794_s29 = smov 32  }
 0x2a9   : > { %1516 = dma.vmem_to_hbm [thread:$0]  (%p3162_p0), %s3004_s5, 8192, %s3001_s4, %s1324_s6, %s1793_s22, %s1793_s22, %s1794_s29  }
 0x2aa PF: > { %s3163_s15 = sld [smem:[#allocation12_spill]]  ;;  %s3164_s16 = sld [smem:[#allocation19_spill]] }
 0x2ab   : > { %s3165_s19 = sld [smem:[#allocation17_spill]] }
 0x2b0   : > { %s1354_s17 = sand.u32 1, %s3163_s15   ;;  %p3166_p1 = scmp.ne.s32.totalorder %s3164_s16, 0 }
 0x2b1   : > { %p3167_p7 = scmp.ge.s32.totalorder %s3165_s19, 2  ;;  %s1355_s27 = scalar_lea.sflag [#allocation5], %s1354_s17 }
 0x2b3   : > { %p1527_p12 = pnand %p3167_p7, %p3166_p1 }
 0x2b5   : > { %1748 = dma.done.wait (!%p1527_p12), %s1355_s27, 8192  }
 0x2b6   : > { %1750 = vsyncadd (!%p1527_p12), %s1355_s27, 4294959104  ;;  %s19_s14 = sadd.s32 1, %s3165_s19   ;;  %s3168_s9 = sld [smem:[#allocation13_spill]] }
 0x2b7   : > { %p16_p4 = scmp.ge.s32.totalorder %s19_s14, 4   ;;  %s3169_s10 = sld [smem:[#allocation14_spill]] }
 0x2b8   : > { %s3170_s11 = sld [smem:[#allocation21_spill]]  ;;  %s3171_s12 = sld [smem:[#allocation16_spill]] }
 0x2b9   : > { %s3172_s13 = sld [smem:[#allocation20_spill]]  ;;  %18 = sbr.rel (!%p16_p4) target bundleno = 11 (0xb), region = 102 }
 0x2c0   :  { %1360 = vsyncpa [#allocation4], 1 }
 0x2c1   :  { %1362 = vsyncpa [#allocation4 + $0x1], 1 }
 0x2c2   :  { %1363 = vsyncpa [#allocation5], 1 }
 0x2c3   :  { %1365 = vsyncpa [#allocation5 + $0x1], 1 }
 0x2c4   :  { %1366 = vsyncpa [#allocation6], 1 }
 0x2c5   :  { %1368 = vsyncpa [#allocation6 + $0x1], 1 }

</bundles_post_ra>
